<compile_context>
chip_gen: v7x
topology: tpu7x:2x2x1
jax: 0.10.0
libtpu: 0.0.40
codegen_flags: <defaults>
</compile_context>

<pallas_src>
import jax
import jax.numpy as jnp
from jax.experimental import pallas as pl
from jax.experimental.pallas import tpu as pltpu


def _round_up(x, m):
    return (x + m - 1) // m * m


def _critic_kernel(obs_ref, hx0_ref, cx0_ref,
                   wb_ref, bb_ref,
                   wih_ref, whh_ref, bgate_ref,
                   wq_ref, bq_ref,
                   q_ref,
                   gx_s, hall_s):
    """Fused forward. Shapes (Bp = padded batch, Hp = padded hidden, Ap = padded out):
       obs_ref (S*Bp, F) bf16 | hx0/cx0 (Bp, Hp) f32
       wb (F, Hp) bf16, bb (1, Hp) f32
       wih/whh (Hp, 4Hp) bf16, bgate (1, 4Hp) f32 (= bih + bhh)
       wq (Hp, Ap) bf16, bq (1, Ap) f32
       q_ref (S*Bp, Ap) f32 | gx_s (S*Bp, 4Hp) f32 | hall_s (S*Bp, Hp) f32
    """
    Bp, Hp = hx0_ref.shape
    S = gx_s.shape[0] // Bp

    # ---- Pass A: time-independent matmuls, batched over all S*Bp rows ----
    x = jnp.dot(obs_ref[...], wb_ref[...],
                preferred_element_type=jnp.float32) + bb_ref[...]
    x = jnp.maximum(x, 0.0)                                    # (S*Bp, Hp) f32
    gx_s[...] = jnp.dot(x.astype(wih_ref.dtype), wih_ref[...],
                        preferred_element_type=jnp.float32) + bgate_ref[...]

    # ---- Pass B: sequential LSTM recurrence (only h @ Whh on critical path) ----
    h = hx0_ref[...]                                           # (Bp, Hp) f32
    c = cx0_ref[...]
    for t in range(S):                     # S small & static: fully unrolled
        rows = pl.ds(t * Bp, Bp)                               # sublane-aligned slab
        gates = gx_s[rows, :] + jnp.dot(h.astype(whh_ref.dtype), whh_ref[...],
                                        preferred_element_type=jnp.float32)
        # PyTorch LSTMCell gate order: i, f, g, o (each slice is 128-lane aligned)
        i_g = jax.nn.sigmoid(gates[:, 0:Hp])
        f_g = jax.nn.sigmoid(gates[:, Hp:2 * Hp])
        g_g = jnp.tanh(gates[:, 2 * Hp:3 * Hp])
        o_g = jax.nn.sigmoid(gates[:, 3 * Hp:4 * Hp])
        c = f_g * c + i_g * g_g
        h = o_g * jnp.tanh(c)
        hall_s[rows, :] = h

    # ---- Pass C: q head as a single batched, lane-dense matmul ----
    q_ref[...] = jnp.dot(hall_s[...].astype(wq_ref.dtype), wq_ref[...],
                         preferred_element_type=jnp.float32) + bq_ref[...]


def mlp_lstm_critic_forward(obs, lstm_hxs, params, matmul_dtype=jnp.bfloat16):
    """obs: (B, S, F) f32; lstm_hxs: (hx, cx) each (B, H) f32; returns (B, S, A) f32."""
    hx, cx = lstm_hxs
    B, S, F = obs.shape
    H = hx.shape[-1]
    A = params["wq"].shape[-1]

    Bp = _round_up(B, 8)      # fill sublanes
    Hp = _round_up(H, 128)    # fill lanes; gate slices become 128-aligned
    Ap = _round_up(A, 128)    # lane-dense q output (unmasked stores)

    pad_b = Bp - B
    pad_h = Hp - H
    pad_a = Ap - A

    # Zero-padding is exact for the real rows/cols: padded x columns are 0,
    # padded gate pre-activations are 0 => padded c,h stay exactly 0 forever.
    obs_p = jnp.pad(obs, ((0, pad_b), (0, 0), (0, 0)))
    hx_p = jnp.pad(hx.astype(jnp.float32), ((0, pad_b), (0, pad_h)))
    cx_p = jnp.pad(cx.astype(jnp.float32), ((0, pad_b), (0, pad_h)))

    wb = jnp.pad(params["wb"], ((0, 0), (0, pad_h)))
    bb = jnp.pad(params["bb"], ((0, 0), (0, pad_h)))

    def pad_gate_cols(w):  # (..., 4H) -> (..., 4Hp): each gate block H -> Hp
        blocks = jnp.split(w, 4, axis=-1)
        pads = [(0, 0)] * (w.ndim - 1) + [(0, pad_h)]
        return jnp.concatenate([jnp.pad(blk, pads) for blk in blocks], axis=-1)

    wih = jnp.pad(pad_gate_cols(params["wih"]), ((0, pad_h), (0, 0)))
    whh = jnp.pad(pad_gate_cols(params["whh"]), ((0, pad_h), (0, 0)))
    bgate = pad_gate_cols(params["bih"] + params["bhh"])
    wq = jnp.pad(params["wq"], ((0, pad_h), (0, pad_a)))
    bq = jnp.pad(params["bq"], ((0, 0), (0, pad_a)))

    # Time-major flatten: row = t*Bp + b, so timestep t is rows [t*Bp, (t+1)*Bp).
    obs_tm = jnp.transpose(obs_p, (1, 0, 2)).reshape(S * Bp, F)

    md = matmul_dtype
    q_flat = pl.pallas_call(
        _critic_kernel,
        out_shape=jax.ShapeDtypeStruct((S * Bp, Ap), jnp.float32),
        in_specs=[pl.BlockSpec(memory_space=pltpu.MemorySpace.VMEM)] * 10,
        out_specs=pl.BlockSpec(memory_space=pltpu.MemorySpace.VMEM),
        scratch_shapes=[pltpu.VMEM((S * Bp, 4 * Hp), jnp.float32),   # gx
                        pltpu.VMEM((S * Bp, Hp), jnp.float32)],      # h_all
        compiler_params=pltpu.CompilerParams(vmem_limit_bytes=64 << 20),
    )(obs_tm.astype(md), hx_p, cx_p,
      wb.astype(md), bb.astype(jnp.float32),
      wih.astype(md), whh.astype(md), bgate.astype(jnp.float32),
      wq.astype(md), bq.astype(jnp.float32))

    q = q_flat.reshape(S, Bp, Ap)[:, :B, :A]
    return jnp.transpose(q, (1, 0, 2))                               # (B, S, A)


def _reference_forward(obs, lstm_hxs, params, matmul_dtype=jnp.bfloat16):
    """Pure-JAX mirror of the PyTorch forward, mirroring the kernel's bf16
    rounding of MXU operands (f32 accumulation / elementwise) for a tight check."""
    hx, cx = lstm_hxs
    B, S, F = obs.shape
    H = hx.shape[-1]
    r = lambda a: a.astype(matmul_dtype).astype(jnp.float32)

    x = obs.reshape(B * S, F)
    x = jnp.maximum(jnp.dot(r(x), r(params["wb"])) + params["bb"], 0.0)
    gx = jnp.dot(r(x), r(params["wih"])) + params["bih"] + params["bhh"]
    gx = gx.reshape(B, S, 4 * H)

    outs = []
    for t in range(S):
        gates = gx[:, t] + jnp.dot(r(hx), r(params["whh"]))
        i_g = jax.nn.sigmoid(gates[:, 0:H])
        f_g = jax.nn.sigmoid(gates[:, H:2 * H])
        g_g = jnp.tanh(gates[:, 2 * H:3 * H])
        o_g = jax.nn.sigmoid(gates[:, 3 * H:4 * H])
        cx = f_g * cx + i_g * g_g
        hx = o_g * jnp.tanh(cx)
        outs.append(hx)
    out = jnp.stack(outs, axis=1)                                    # (B, S, H)
    q = jnp.dot(r(out.reshape(B * S, H)), r(params["wq"])) + params["bq"]
    return q.reshape(B, S, -1)


def init_params(key, f, hidden, n_outputs):
    ks = jax.random.split(key, 8)
    scale = 0.1
    return {
        # body Linear(F -> H): stored as (F, H) so x @ W
        "wb": scale * jax.random.normal(ks[0], (f, hidden), jnp.float32),
        "bb": scale * jax.random.normal(ks[1], (1, hidden), jnp.float32),
        # LSTMCell: PyTorch weight_ih is (4H, H_in); we store transposed (H_in, 4H)
        "wih": scale * jax.random.normal(ks[2], (hidden, 4 * hidden), jnp.float32),
        "whh": scale * jax.random.normal(ks[3], (hidden, 4 * hidden), jnp.float32),
        "bih": scale * jax.random.normal(ks[4], (1, 4 * hidden), jnp.float32),
        "bhh": scale * jax.random.normal(ks[5], (1, 4 * hidden), jnp.float32),
        # q_value Linear(H -> A)
        "wq": scale * jax.random.normal(ks[6], (hidden, n_outputs), jnp.float32),
        "bq": scale * jax.random.normal(ks[7], (1, n_outputs), jnp.float32),
    }


if __name__ == "__main__":
    B, S, F, H, A = 2, 8, 16, 32, 4   # batch, seq, features, hidden, n_outputs

    key = jax.random.PRNGKey(0)
    k_obs, k_hx, k_cx, k_par = jax.random.split(key, 4)
    obs = jax.random.normal(k_obs, (B, S, F), jnp.float32)
    hx = jax.random.normal(k_hx, (B, H), jnp.float32)
    cx = jax.random.normal(k_cx, (B, H), jnp.float32)
    params = init_params(k_par, F, H, A)

    fwd = jax.jit(mlp_lstm_critic_forward)        # pad/transpose + kernel in one program
    q = jax.block_until_ready(fwd(obs, (hx, cx), params))

    q_ref = _reference_forward(obs, (hx, cx), params)
    assert q.shape == (B, S, A)
    err = float(jnp.max(jnp.abs(q - q_ref)))
    assert err < 5e-3, f"mismatch vs pure-JAX reference: {err}"

    print("KERNEL_OK")
</pallas_src>

<mosaic_0001>
module attributes {stable_mosaic.version = 11 : i64} {
  func.func @_critic_kernel(%arg0: memref<64x16xbf16, #tpu.memory_space<vmem>>, %arg1: memref<8x128xf32, #tpu.memory_space<vmem>>, %arg2: memref<8x128xf32, #tpu.memory_space<vmem>>, %arg3: memref<16x128xbf16, #tpu.memory_space<vmem>>, %arg4: memref<1x128xf32, #tpu.memory_space<vmem>>, %arg5: memref<128x512xbf16, #tpu.memory_space<vmem>>, %arg6: memref<128x512xbf16, #tpu.memory_space<vmem>>, %arg7: memref<1x512xf32, #tpu.memory_space<vmem>>, %arg8: memref<128x128xbf16, #tpu.memory_space<vmem>>, %arg9: memref<1x128xf32, #tpu.memory_space<vmem>>, %arg10: memref<64x128xf32, #tpu.memory_space<vmem>>, %arg11: memref<64x512xf32, #tpu.memory_space<vmem>>, %arg12: memref<64x128xf32, #tpu.memory_space<vmem>>) attributes {dimension_semantics = [], scalar_prefetch = 0 : i64, scratch_operands = 2 : i64, tpu.core_type = #tpu.core_type<tc>} {
    %c0 = arith.constant 0 : index
    %c0_0 = arith.constant 0 : index
    %0 = vector.load %arg0[%c0, %c0_0] : memref<64x16xbf16, #tpu.memory_space<vmem>>, vector<64x16xbf16>
    %c0_1 = arith.constant 0 : index
    %c0_2 = arith.constant 0 : index
    %1 = vector.load %arg3[%c0_1, %c0_2] : memref<16x128xbf16, #tpu.memory_space<vmem>>, vector<16x128xbf16>
    %cst = arith.constant dense<0.000000e+00> : vector<64x128xf32>
    %2 = tpu.matmul %0, %1, %cst {dimension_numbers = #tpu.dot_dimension_numbers<[1], [0], [0], [1], [0, 0, 1, 1], [], []>} : vector<64x16xbf16>, vector<16x128xbf16>, vector<64x128xf32> -> vector<64x128xf32>
    %c0_3 = arith.constant 0 : index
    %c0_4 = arith.constant 0 : index
    %3 = vector.load %arg4[%c0_3, %c0_4] : memref<1x128xf32, #tpu.memory_space<vmem>>, vector<1x128xf32>
    %4 = vector.broadcast %3 : vector<1x128xf32> to vector<64x128xf32>
    %5 = arith.addf %2, %4 : vector<64x128xf32>
    %cst_5 = arith.constant 0.000000e+00 : f32
    %6 = vector.broadcast %cst_5 : f32 to vector<64x128xf32>
    %7 = arith.maximumf %5, %6 : vector<64x128xf32>
    %8 = arith.truncf %7 : vector<64x128xf32> to vector<64x128xbf16>
    %c0_6 = arith.constant 0 : index
    %c0_7 = arith.constant 0 : index
    %9 = vector.load %arg5[%c0_6, %c0_7] : memref<128x512xbf16, #tpu.memory_space<vmem>>, vector<128x512xbf16>
    %cst_8 = arith.constant dense<0.000000e+00> : vector<64x512xf32>
    %10 = tpu.matmul %8, %9, %cst_8 {dimension_numbers = #tpu.dot_dimension_numbers<[1], [0], [0], [1], [0, 0, 1, 1], [], []>} : vector<64x128xbf16>, vector<128x512xbf16>, vector<64x512xf32> -> vector<64x512xf32>
    %c0_9 = arith.constant 0 : index
    %c0_10 = arith.constant 0 : index
    %11 = vector.load %arg7[%c0_9, %c0_10] : memref<1x512xf32, #tpu.memory_space<vmem>>, vector<1x512xf32>
    %12 = vector.broadcast %11 : vector<1x512xf32> to vector<64x512xf32>
    %13 = arith.addf %10, %12 : vector<64x512xf32>
    %c0_11 = arith.constant 0 : index
    %c0_12 = arith.constant 0 : index
    %14 = vector.load %arg11[%c0_11, %c0_12] : memref<64x512xf32, #tpu.memory_space<vmem>>, vector<64x512xf32>
    tpu.vector_store %arg11[%c0_11, %c0_12], %13 {strides = array<i32>} : memref<64x512xf32, #tpu.memory_space<vmem>>, vector<64x512xf32>,
    %c0_13 = arith.constant 0 : index
    %c0_14 = arith.constant 0 : index
    %15 = vector.load %arg1[%c0_13, %c0_14] : memref<8x128xf32, #tpu.memory_space<vmem>>, vector<8x128xf32>
    %c0_15 = arith.constant 0 : index
    %c0_16 = arith.constant 0 : index
    %16 = vector.load %arg2[%c0_15, %c0_16] : memref<8x128xf32, #tpu.memory_space<vmem>>, vector<8x128xf32>
    %c0_17 = arith.constant 0 : index
    %c0_18 = arith.constant 0 : index
    %17 = vector.load %arg11[%c0_17, %c0_18] : memref<64x512xf32, #tpu.memory_space<vmem>>, vector<8x512xf32>
    %18 = arith.truncf %15 : vector<8x128xf32> to vector<8x128xbf16>
    %c0_19 = arith.constant 0 : index
    %c0_20 = arith.constant 0 : index
    %19 = vector.load %arg6[%c0_19, %c0_20] : memref<128x512xbf16, #tpu.memory_space<vmem>>, vector<128x512xbf16>
    %cst_21 = arith.constant dense<0.000000e+00> : vector<8x512xf32>
    %20 = tpu.matmul %18, %19, %cst_21 {dimension_numbers = #tpu.dot_dimension_numbers<[1], [0], [0], [1], [0, 0, 1, 1], [], []>} : vector<8x128xbf16>, vector<128x512xbf16>, vector<8x512xf32> -> vector<8x512xf32>
    %21 = arith.addf %17, %20 : vector<8x512xf32>
    %22 = vector.extract_strided_slice %21 {offsets = [0, 0], sizes = [8, 128], strides = [1, 1]} : vector<8x512xf32> to vector<8x128xf32>
    %23 = arith.negf %22 : vector<8x128xf32>
    %24 = math.exp %23 : vector<8x128xf32>
    %cst_22 = arith.constant 1.000000e+00 : f32
    %25 = vector.broadcast %cst_22 : f32 to vector<8x128xf32>
    %26 = arith.addf %25, %24 : vector<8x128xf32>
    %27 = arith.divf %25, %26 : vector<8x128xf32>
    %28 = vector.extract_strided_slice %21 {offsets = [0, 128], sizes = [8, 128], strides = [1, 1]} : vector<8x512xf32> to vector<8x128xf32>
    %29 = arith.negf %28 : vector<8x128xf32>
    %30 = math.exp %29 : vector<8x128xf32>
    %cst_23 = arith.constant 1.000000e+00 : f32
    %31 = vector.broadcast %cst_23 : f32 to vector<8x128xf32>
    %32 = arith.addf %31, %30 : vector<8x128xf32>
    %33 = arith.divf %31, %32 : vector<8x128xf32>
    %34 = vector.extract_strided_slice %21 {offsets = [0, 256], sizes = [8, 128], strides = [1, 1]} : vector<8x512xf32> to vector<8x128xf32>
    %35 = math.tanh %34 : vector<8x128xf32>
    %36 = vector.extract_strided_slice %21 {offsets = [0, 384], sizes = [8, 128], strides = [1, 1]} : vector<8x512xf32> to vector<8x128xf32>
    %37 = arith.negf %36 : vector<8x128xf32>
    %38 = math.exp %37 : vector<8x128xf32>
    %cst_24 = arith.constant 1.000000e+00 : f32
    %39 = vector.broadcast %cst_24 : f32 to vector<8x128xf32>
    %40 = arith.addf %39, %38 : vector<8x128xf32>
    %41 = arith.divf %39, %40 : vector<8x128xf32>
    %42 = arith.mulf %33, %16 : vector<8x128xf32>
    %43 = arith.mulf %27, %35 : vector<8x128xf32>
    %44 = arith.addf %42, %43 : vector<8x128xf32>
    %45 = math.tanh %44 : vector<8x128xf32>
    %46 = arith.mulf %41, %45 : vector<8x128xf32>
    %c0_25 = arith.constant 0 : index
    %c0_26 = arith.constant 0 : index
    %47 = vector.load %arg12[%c0_25, %c0_26] : memref<64x128xf32, #tpu.memory_space<vmem>>, vector<8x128xf32>
    tpu.vector_store %arg12[%c0_25, %c0_26], %46 {strides = array<i32>} : memref<64x128xf32, #tpu.memory_space<vmem>>, vector<8x128xf32>,
    %c8 = arith.constant 8 : index
    %c0_27 = arith.constant 0 : index
    %48 = vector.load %arg11[%c8, %c0_27] : memref<64x512xf32, #tpu.memory_space<vmem>>, vector<8x512xf32>
    %49 = arith.truncf %46 : vector<8x128xf32> to vector<8x128xbf16>
    %c0_28 = arith.constant 0 : index
    %c0_29 = arith.constant 0 : index
    %50 = vector.load %arg6[%c0_28, %c0_29] : memref<128x512xbf16, #tpu.memory_space<vmem>>, vector<128x512xbf16>
    %cst_30 = arith.constant dense<0.000000e+00> : vector<8x512xf32>
    %51 = tpu.matmul %49, %50, %cst_30 {dimension_numbers = #tpu.dot_dimension_numbers<[1], [0], [0], [1], [0, 0, 1, 1], [], []>} : vector<8x128xbf16>, vector<128x512xbf16>, vector<8x512xf32> -> vector<8x512xf32>
    %52 = arith.addf %48, %51 : vector<8x512xf32>
    %53 = vector.extract_strided_slice %52 {offsets = [0, 0], sizes = [8, 128], strides = [1, 1]} : vector<8x512xf32> to vector<8x128xf32>
    %54 = arith.negf %53 : vector<8x128xf32>
    %55 = math.exp %54 : vector<8x128xf32>
    %cst_31 = arith.constant 1.000000e+00 : f32
    %56 = vector.broadcast %cst_31 : f32 to vector<8x128xf32>
    %57 = arith.addf %56, %55 : vector<8x128xf32>
    %58 = arith.divf %56, %57 : vector<8x128xf32>
    %59 = vector.extract_strided_slice %52 {offsets = [0, 128], sizes = [8, 128], strides = [1, 1]} : vector<8x512xf32> to vector<8x128xf32>
    %60 = arith.negf %59 : vector<8x128xf32>
    %61 = math.exp %60 : vector<8x128xf32>
    %cst_32 = arith.constant 1.000000e+00 : f32
    %62 = vector.broadcast %cst_32 : f32 to vector<8x128xf32>
    %63 = arith.addf %62, %61 : vector<8x128xf32>
    %64 = arith.divf %62, %63 : vector<8x128xf32>
    %65 = vector.extract_strided_slice %52 {offsets = [0, 256], sizes = [8, 128], strides = [1, 1]} : vector<8x512xf32> to vector<8x128xf32>
    %66 = math.tanh %65 : vector<8x128xf32>
    %67 = vector.extract_strided_slice %52 {offsets = [0, 384], sizes = [8, 128], strides = [1, 1]} : vector<8x512xf32> to vector<8x128xf32>
    %68 = arith.negf %67 : vector<8x128xf32>
    %69 = math.exp %68 : vector<8x128xf32>
    %cst_33 = arith.constant 1.000000e+00 : f32
    %70 = vector.broadcast %cst_33 : f32 to vector<8x128xf32>
    %71 = arith.addf %70, %69 : vector<8x128xf32>
    %72 = arith.divf %70, %71 : vector<8x128xf32>
    %73 = arith.mulf %64, %44 : vector<8x128xf32>
    %74 = arith.mulf %58, %66 : vector<8x128xf32>
    %75 = arith.addf %73, %74 : vector<8x128xf32>
    %76 = math.tanh %75 : vector<8x128xf32>
    %77 = arith.mulf %72, %76 : vector<8x128xf32>
    %c8_34 = arith.constant 8 : index
    %c0_35 = arith.constant 0 : index
    %78 = vector.load %arg12[%c8_34, %c0_35] : memref<64x128xf32, #tpu.memory_space<vmem>>, vector<8x128xf32>
    tpu.vector_store %arg12[%c8_34, %c0_35], %77 {strides = array<i32>} : memref<64x128xf32, #tpu.memory_space<vmem>>, vector<8x128xf32>,
    %c16 = arith.constant 16 : index
    %c0_36 = arith.constant 0 : index
    %79 = vector.load %arg11[%c16, %c0_36] : memref<64x512xf32, #tpu.memory_space<vmem>>, vector<8x512xf32>
    %80 = arith.truncf %77 : vector<8x128xf32> to vector<8x128xbf16>
    %c0_37 = arith.constant 0 : index
    %c0_38 = arith.constant 0 : index
    %81 = vector.load %arg6[%c0_37, %c0_38] : memref<128x512xbf16, #tpu.memory_space<vmem>>, vector<128x512xbf16>
    %cst_39 = arith.constant dense<0.000000e+00> : vector<8x512xf32>
    %82 = tpu.matmul %80, %81, %cst_39 {dimension_numbers = #tpu.dot_dimension_numbers<[1], [0], [0], [1], [0, 0, 1, 1], [], []>} : vector<8x128xbf16>, vector<128x512xbf16>, vector<8x512xf32> -> vector<8x512xf32>
    %83 = arith.addf %79, %82 : vector<8x512xf32>
    %84 = vector.extract_strided_slice %83 {offsets = [0, 0], sizes = [8, 128], strides = [1, 1]} : vector<8x512xf32> to vector<8x128xf32>
    %85 = arith.negf %84 : vector<8x128xf32>
    %86 = math.exp %85 : vector<8x128xf32>
    %cst_40 = arith.constant 1.000000e+00 : f32
    %87 = vector.broadcast %cst_40 : f32 to vector<8x128xf32>
    %88 = arith.addf %87, %86 : vector<8x128xf32>
    %89 = arith.divf %87, %88 : vector<8x128xf32>
    %90 = vector.extract_strided_slice %83 {offsets = [0, 128], sizes = [8, 128], strides = [1, 1]} : vector<8x512xf32> to vector<8x128xf32>
    %91 = arith.negf %90 : vector<8x128xf32>
    %92 = math.exp %91 : vector<8x128xf32>
    %cst_41 = arith.constant 1.000000e+00 : f32
    %93 = vector.broadcast %cst_41 : f32 to vector<8x128xf32>
    %94 = arith.addf %93, %92 : vector<8x128xf32>
    %95 = arith.divf %93, %94 : vector<8x128xf32>
    %96 = vector.extract_strided_slice %83 {offsets = [0, 256], sizes = [8, 128], strides = [1, 1]} : vector<8x512xf32> to vector<8x128xf32>
    %97 = math.tanh %96 : vector<8x128xf32>
    %98 = vector.extract_strided_slice %83 {offsets = [0, 384], sizes = [8, 128], strides = [1, 1]} : vector<8x512xf32> to vector<8x128xf32>
    %99 = arith.negf %98 : vector<8x128xf32>
    %100 = math.exp %99 : vector<8x128xf32>
    %cst_42 = arith.constant 1.000000e+00 : f32
    %101 = vector.broadcast %cst_42 : f32 to vector<8x128xf32>
    %102 = arith.addf %101, %100 : vector<8x128xf32>
    %103 = arith.divf %101, %102 : vector<8x128xf32>
    %104 = arith.mulf %95, %75 : vector<8x128xf32>
    %105 = arith.mulf %89, %97 : vector<8x128xf32>
    %106 = arith.addf %104, %105 : vector<8x128xf32>
    %107 = math.tanh %106 : vector<8x128xf32>
    %108 = arith.mulf %103, %107 : vector<8x128xf32>
    %c16_43 = arith.constant 16 : index
    %c0_44 = arith.constant 0 : index
    %109 = vector.load %arg12[%c16_43, %c0_44] : memref<64x128xf32, #tpu.memory_space<vmem>>, vector<8x128xf32>
    tpu.vector_store %arg12[%c16_43, %c0_44], %108 {strides = array<i32>} : memref<64x128xf32, #tpu.memory_space<vmem>>, vector<8x128xf32>,
    %c24 = arith.constant 24 : index
    %c0_45 = arith.constant 0 : index
    %110 = vector.load %arg11[%c24, %c0_45] : memref<64x512xf32, #tpu.memory_space<vmem>>, vector<8x512xf32>
    %111 = arith.truncf %108 : vector<8x128xf32> to vector<8x128xbf16>
    %c0_46 = arith.constant 0 : index
    %c0_47 = arith.constant 0 : index
    %112 = vector.load %arg6[%c0_46, %c0_47] : memref<128x512xbf16, #tpu.memory_space<vmem>>, vector<128x512xbf16>
    %cst_48 = arith.constant dense<0.000000e+00> : vector<8x512xf32>
    %113 = tpu.matmul %111, %112, %cst_48 {dimension_numbers = #tpu.dot_dimension_numbers<[1], [0], [0], [1], [0, 0, 1, 1], [], []>} : vector<8x128xbf16>, vector<128x512xbf16>, vector<8x512xf32> -> vector<8x512xf32>
    %114 = arith.addf %110, %113 : vector<8x512xf32>
    %115 = vector.extract_strided_slice %114 {offsets = [0, 0], sizes = [8, 128], strides = [1, 1]} : vector<8x512xf32> to vector<8x128xf32>
    %116 = arith.negf %115 : vector<8x128xf32>
    %117 = math.exp %116 : vector<8x128xf32>
    %cst_49 = arith.constant 1.000000e+00 : f32
    %118 = vector.broadcast %cst_49 : f32 to vector<8x128xf32>
    %119 = arith.addf %118, %117 : vector<8x128xf32>
    %120 = arith.divf %118, %119 : vector<8x128xf32>
    %121 = vector.extract_strided_slice %114 {offsets = [0, 128], sizes = [8, 128], strides = [1, 1]} : vector<8x512xf32> to vector<8x128xf32>
    %122 = arith.negf %121 : vector<8x128xf32>
    %123 = math.exp %122 : vector<8x128xf32>
    %cst_50 = arith.constant 1.000000e+00 : f32
    %124 = vector.broadcast %cst_50 : f32 to vector<8x128xf32>
    %125 = arith.addf %124, %123 : vector<8x128xf32>
    %126 = arith.divf %124, %125 : vector<8x128xf32>
    %127 = vector.extract_strided_slice %114 {offsets = [0, 256], sizes = [8, 128], strides = [1, 1]} : vector<8x512xf32> to vector<8x128xf32>
    %128 = math.tanh %127 : vector<8x128xf32>
    %129 = vector.extract_strided_slice %114 {offsets = [0, 384], sizes = [8, 128], strides = [1, 1]} : vector<8x512xf32> to vector<8x128xf32>
    %130 = arith.negf %129 : vector<8x128xf32>
    %131 = math.exp %130 : vector<8x128xf32>
    %cst_51 = arith.constant 1.000000e+00 : f32
    %132 = vector.broadcast %cst_51 : f32 to vector<8x128xf32>
    %133 = arith.addf %132, %131 : vector<8x128xf32>
    %134 = arith.divf %132, %133 : vector<8x128xf32>
    %135 = arith.mulf %126, %106 : vector<8x128xf32>
    %136 = arith.mulf %120, %128 : vector<8x128xf32>
    %137 = arith.addf %135, %136 : vector<8x128xf32>
    %138 = math.tanh %137 : vector<8x128xf32>
    %139 = arith.mulf %134, %138 : vector<8x128xf32>
    %c24_52 = arith.constant 24 : index
    %c0_53 = arith.constant 0 : index
    %140 = vector.load %arg12[%c24_52, %c0_53] : memref<64x128xf32, #tpu.memory_space<vmem>>, vector<8x128xf32>
    tpu.vector_store %arg12[%c24_52, %c0_53], %139 {strides = array<i32>} : memref<64x128xf32, #tpu.memory_space<vmem>>, vector<8x128xf32>,
    %c32 = arith.constant 32 : index
    %c0_54 = arith.constant 0 : index
    %141 = vector.load %arg11[%c32, %c0_54] : memref<64x512xf32, #tpu.memory_space<vmem>>, vector<8x512xf32>
    %142 = arith.truncf %139 : vector<8x128xf32> to vector<8x128xbf16>
    %c0_55 = arith.constant 0 : index
    %c0_56 = arith.constant 0 : index
    %143 = vector.load %arg6[%c0_55, %c0_56] : memref<128x512xbf16, #tpu.memory_space<vmem>>, vector<128x512xbf16>
    %cst_57 = arith.constant dense<0.000000e+00> : vector<8x512xf32>
    %144 = tpu.matmul %142, %143, %cst_57 {dimension_numbers = #tpu.dot_dimension_numbers<[1], [0], [0], [1], [0, 0, 1, 1], [], []>} : vector<8x128xbf16>, vector<128x512xbf16>, vector<8x512xf32> -> vector<8x512xf32>
    %145 = arith.addf %141, %144 : vector<8x512xf32>
    %146 = vector.extract_strided_slice %145 {offsets = [0, 0], sizes = [8, 128], strides = [1, 1]} : vector<8x512xf32> to vector<8x128xf32>
    %147 = arith.negf %146 : vector<8x128xf32>
    %148 = math.exp %147 : vector<8x128xf32>
    %cst_58 = arith.constant 1.000000e+00 : f32
    %149 = vector.broadcast %cst_58 : f32 to vector<8x128xf32>
    %150 = arith.addf %149, %148 : vector<8x128xf32>
    %151 = arith.divf %149, %150 : vector<8x128xf32>
    %152 = vector.extract_strided_slice %145 {offsets = [0, 128], sizes = [8, 128], strides = [1, 1]} : vector<8x512xf32> to vector<8x128xf32>
    %153 = arith.negf %152 : vector<8x128xf32>
    %154 = math.exp %153 : vector<8x128xf32>
    %cst_59 = arith.constant 1.000000e+00 : f32
    %155 = vector.broadcast %cst_59 : f32 to vector<8x128xf32>
    %156 = arith.addf %155, %154 : vector<8x128xf32>
    %157 = arith.divf %155, %156 : vector<8x128xf32>
    %158 = vector.extract_strided_slice %145 {offsets = [0, 256], sizes = [8, 128], strides = [1, 1]} : vector<8x512xf32> to vector<8x128xf32>
    %159 = math.tanh %158 : vector<8x128xf32>
    %160 = vector.extract_strided_slice %145 {offsets = [0, 384], sizes = [8, 128], strides = [1, 1]} : vector<8x512xf32> to vector<8x128xf32>
    %161 = arith.negf %160 : vector<8x128xf32>
    %162 = math.exp %161 : vector<8x128xf32>
    %cst_60 = arith.constant 1.000000e+00 : f32
    %163 = vector.broadcast %cst_60 : f32 to vector<8x128xf32>
    %164 = arith.addf %163, %162 : vector<8x128xf32>
    %165 = arith.divf %163, %164 : vector<8x128xf32>
    %166 = arith.mulf %157, %137 : vector<8x128xf32>
    %167 = arith.mulf %151, %159 : vector<8x128xf32>
    %168 = arith.addf %166, %167 : vector<8x128xf32>
    %169 = math.tanh %168 : vector<8x128xf32>
    %170 = arith.mulf %165, %169 : vector<8x128xf32>
    %c32_61 = arith.constant 32 : index
    %c0_62 = arith.constant 0 : index
    %171 = vector.load %arg12[%c32_61, %c0_62] : memref<64x128xf32, #tpu.memory_space<vmem>>, vector<8x128xf32>
    tpu.vector_store %arg12[%c32_61, %c0_62], %170 {strides = array<i32>} : memref<64x128xf32, #tpu.memory_space<vmem>>, vector<8x128xf32>,
    %c40 = arith.constant 40 : index
    %c0_63 = arith.constant 0 : index
    %172 = vector.load %arg11[%c40, %c0_63] : memref<64x512xf32, #tpu.memory_space<vmem>>, vector<8x512xf32>
    %173 = arith.truncf %170 : vector<8x128xf32> to vector<8x128xbf16>
    %c0_64 = arith.constant 0 : index
    %c0_65 = arith.constant 0 : index
    %174 = vector.load %arg6[%c0_64, %c0_65] : memref<128x512xbf16, #tpu.memory_space<vmem>>, vector<128x512xbf16>
    %cst_66 = arith.constant dense<0.000000e+00> : vector<8x512xf32>
    %175 = tpu.matmul %173, %174, %cst_66 {dimension_numbers = #tpu.dot_dimension_numbers<[1], [0], [0], [1], [0, 0, 1, 1], [], []>} : vector<8x128xbf16>, vector<128x512xbf16>, vector<8x512xf32> -> vector<8x512xf32>
    %176 = arith.addf %172, %175 : vector<8x512xf32>
    %177 = vector.extract_strided_slice %176 {offsets = [0, 0], sizes = [8, 128], strides = [1, 1]} : vector<8x512xf32> to vector<8x128xf32>
    %178 = arith.negf %177 : vector<8x128xf32>
    %179 = math.exp %178 : vector<8x128xf32>
    %cst_67 = arith.constant 1.000000e+00 : f32
    %180 = vector.broadcast %cst_67 : f32 to vector<8x128xf32>
    %181 = arith.addf %180, %179 : vector<8x128xf32>
    %182 = arith.divf %180, %181 : vector<8x128xf32>
    %183 = vector.extract_strided_slice %176 {offsets = [0, 128], sizes = [8, 128], strides = [1, 1]} : vector<8x512xf32> to vector<8x128xf32>
    %184 = arith.negf %183 : vector<8x128xf32>
    %185 = math.exp %184 : vector<8x128xf32>
    %cst_68 = arith.constant 1.000000e+00 : f32
    %186 = vector.broadcast %cst_68 : f32 to vector<8x128xf32>
    %187 = arith.addf %186, %185 : vector<8x128xf32>
    %188 = arith.divf %186, %187 : vector<8x128xf32>
    %189 = vector.extract_strided_slice %176 {offsets = [0, 256], sizes = [8, 128], strides = [1, 1]} : vector<8x512xf32> to vector<8x128xf32>
    %190 = math.tanh %189 : vector<8x128xf32>
    %191 = vector.extract_strided_slice %176 {offsets = [0, 384], sizes = [8, 128], strides = [1, 1]} : vector<8x512xf32> to vector<8x128xf32>
    %192 = arith.negf %191 : vector<8x128xf32>
    %193 = math.exp %192 : vector<8x128xf32>
    %cst_69 = arith.constant 1.000000e+00 : f32
    %194 = vector.broadcast %cst_69 : f32 to vector<8x128xf32>
    %195 = arith.addf %194, %193 : vector<8x128xf32>
    %196 = arith.divf %194, %195 : vector<8x128xf32>
    %197 = arith.mulf %188, %168 : vector<8x128xf32>
    %198 = arith.mulf %182, %190 : vector<8x128xf32>
    %199 = arith.addf %197, %198 : vector<8x128xf32>
    %200 = math.tanh %199 : vector<8x128xf32>
    %201 = arith.mulf %196, %200 : vector<8x128xf32>
    %c40_70 = arith.constant 40 : index
    %c0_71 = arith.constant 0 : index
    %202 = vector.load %arg12[%c40_70, %c0_71] : memref<64x128xf32, #tpu.memory_space<vmem>>, vector<8x128xf32>
    tpu.vector_store %arg12[%c40_70, %c0_71], %201 {strides = array<i32>} : memref<64x128xf32, #tpu.memory_space<vmem>>, vector<8x128xf32>,
    %c48 = arith.constant 48 : index
    %c0_72 = arith.constant 0 : index
    %203 = vector.load %arg11[%c48, %c0_72] : memref<64x512xf32, #tpu.memory_space<vmem>>, vector<8x512xf32>
    %204 = arith.truncf %201 : vector<8x128xf32> to vector<8x128xbf16>
    %c0_73 = arith.constant 0 : index
    %c0_74 = arith.constant 0 : index
    %205 = vector.load %arg6[%c0_73, %c0_74] : memref<128x512xbf16, #tpu.memory_space<vmem>>, vector<128x512xbf16>
    %cst_75 = arith.constant dense<0.000000e+00> : vector<8x512xf32>
    %206 = tpu.matmul %204, %205, %cst_75 {dimension_numbers = #tpu.dot_dimension_numbers<[1], [0], [0], [1], [0, 0, 1, 1], [], []>} : vector<8x128xbf16>, vector<128x512xbf16>, vector<8x512xf32> -> vector<8x512xf32>
    %207 = arith.addf %203, %206 : vector<8x512xf32>
    %208 = vector.extract_strided_slice %207 {offsets = [0, 0], sizes = [8, 128], strides = [1, 1]} : vector<8x512xf32> to vector<8x128xf32>
    %209 = arith.negf %208 : vector<8x128xf32>
    %210 = math.exp %209 : vector<8x128xf32>
    %cst_76 = arith.constant 1.000000e+00 : f32
    %211 = vector.broadcast %cst_76 : f32 to vector<8x128xf32>
    %212 = arith.addf %211, %210 : vector<8x128xf32>
    %213 = arith.divf %211, %212 : vector<8x128xf32>
    %214 = vector.extract_strided_slice %207 {offsets = [0, 128], sizes = [8, 128], strides = [1, 1]} : vector<8x512xf32> to vector<8x128xf32>
    %215 = arith.negf %214 : vector<8x128xf32>
    %216 = math.exp %215 : vector<8x128xf32>
    %cst_77 = arith.constant 1.000000e+00 : f32
    %217 = vector.broadcast %cst_77 : f32 to vector<8x128xf32>
    %218 = arith.addf %217, %216 : vector<8x128xf32>
    %219 = arith.divf %217, %218 : vector<8x128xf32>
    %220 = vector.extract_strided_slice %207 {offsets = [0, 256], sizes = [8, 128], strides = [1, 1]} : vector<8x512xf32> to vector<8x128xf32>
    %221 = math.tanh %220 : vector<8x128xf32>
    %222 = vector.extract_strided_slice %207 {offsets = [0, 384], sizes = [8, 128], strides = [1, 1]} : vector<8x512xf32> to vector<8x128xf32>
    %223 = arith.negf %222 : vector<8x128xf32>
    %224 = math.exp %223 : vector<8x128xf32>
    %cst_78 = arith.constant 1.000000e+00 : f32
    %225 = vector.broadcast %cst_78 : f32 to vector<8x128xf32>
    %226 = arith.addf %225, %224 : vector<8x128xf32>
    %227 = arith.divf %225, %226 : vector<8x128xf32>
    %228 = arith.mulf %219, %199 : vector<8x128xf32>
    %229 = arith.mulf %213, %221 : vector<8x128xf32>
    %230 = arith.addf %228, %229 : vector<8x128xf32>
    %231 = math.tanh %230 : vector<8x128xf32>
    %232 = arith.mulf %227, %231 : vector<8x128xf32>
    %c48_79 = arith.constant 48 : index
    %c0_80 = arith.constant 0 : index
    %233 = vector.load %arg12[%c48_79, %c0_80] : memref<64x128xf32, #tpu.memory_space<vmem>>, vector<8x128xf32>
    tpu.vector_store %arg12[%c48_79, %c0_80], %232 {strides = array<i32>} : memref<64x128xf32, #tpu.memory_space<vmem>>, vector<8x128xf32>,
    %c56 = arith.constant 56 : index
    %c0_81 = arith.constant 0 : index
    %234 = vector.load %arg11[%c56, %c0_81] : memref<64x512xf32, #tpu.memory_space<vmem>>, vector<8x512xf32>
    %235 = arith.truncf %232 : vector<8x128xf32> to vector<8x128xbf16>
    %c0_82 = arith.constant 0 : index
    %c0_83 = arith.constant 0 : index
    %236 = vector.load %arg6[%c0_82, %c0_83] : memref<128x512xbf16, #tpu.memory_space<vmem>>, vector<128x512xbf16>
    %cst_84 = arith.constant dense<0.000000e+00> : vector<8x512xf32>
    %237 = tpu.matmul %235, %236, %cst_84 {dimension_numbers = #tpu.dot_dimension_numbers<[1], [0], [0], [1], [0, 0, 1, 1], [], []>} : vector<8x128xbf16>, vector<128x512xbf16>, vector<8x512xf32> -> vector<8x512xf32>
    %238 = arith.addf %234, %237 : vector<8x512xf32>
    %239 = vector.extract_strided_slice %238 {offsets = [0, 0], sizes = [8, 128], strides = [1, 1]} : vector<8x512xf32> to vector<8x128xf32>
    %240 = arith.negf %239 : vector<8x128xf32>
    %241 = math.exp %240 : vector<8x128xf32>
    %cst_85 = arith.constant 1.000000e+00 : f32
    %242 = vector.broadcast %cst_85 : f32 to vector<8x128xf32>
    %243 = arith.addf %242, %241 : vector<8x128xf32>
    %244 = arith.divf %242, %243 : vector<8x128xf32>
    %245 = vector.extract_strided_slice %238 {offsets = [0, 128], sizes = [8, 128], strides = [1, 1]} : vector<8x512xf32> to vector<8x128xf32>
    %246 = arith.negf %245 : vector<8x128xf32>
    %247 = math.exp %246 : vector<8x128xf32>
    %cst_86 = arith.constant 1.000000e+00 : f32
    %248 = vector.broadcast %cst_86 : f32 to vector<8x128xf32>
    %249 = arith.addf %248, %247 : vector<8x128xf32>
    %250 = arith.divf %248, %249 : vector<8x128xf32>
    %251 = vector.extract_strided_slice %238 {offsets = [0, 256], sizes = [8, 128], strides = [1, 1]} : vector<8x512xf32> to vector<8x128xf32>
    %252 = math.tanh %251 : vector<8x128xf32>
    %253 = vector.extract_strided_slice %238 {offsets = [0, 384], sizes = [8, 128], strides = [1, 1]} : vector<8x512xf32> to vector<8x128xf32>
    %254 = arith.negf %253 : vector<8x128xf32>
    %255 = math.exp %254 : vector<8x128xf32>
    %cst_87 = arith.constant 1.000000e+00 : f32
    %256 = vector.broadcast %cst_87 : f32 to vector<8x128xf32>
    %257 = arith.addf %256, %255 : vector<8x128xf32>
    %258 = arith.divf %256, %257 : vector<8x128xf32>
    %259 = arith.mulf %250, %230 : vector<8x128xf32>
    %260 = arith.mulf %244, %252 : vector<8x128xf32>
    %261 = arith.addf %259, %260 : vector<8x128xf32>
    %262 = math.tanh %261 : vector<8x128xf32>
    %263 = arith.mulf %258, %262 : vector<8x128xf32>
    %c56_88 = arith.constant 56 : index
    %c0_89 = arith.constant 0 : index
    %264 = vector.load %arg12[%c56_88, %c0_89] : memref<64x128xf32, #tpu.memory_space<vmem>>, vector<8x128xf32>
    tpu.vector_store %arg12[%c56_88, %c0_89], %263 {strides = array<i32>} : memref<64x128xf32, #tpu.memory_space<vmem>>, vector<8x128xf32>,
    %c0_90 = arith.constant 0 : index
    %c0_91 = arith.constant 0 : index
    %265 = vector.load %arg12[%c0_90, %c0_91] : memref<64x128xf32, #tpu.memory_space<vmem>>, vector<64x128xf32>
    %266 = arith.truncf %265 : vector<64x128xf32> to vector<64x128xbf16>
    %c0_92 = arith.constant 0 : index
    %c0_93 = arith.constant 0 : index
    %267 = vector.load %arg8[%c0_92, %c0_93] : memref<128x128xbf16, #tpu.memory_space<vmem>>, vector<128x128xbf16>
    %cst_94 = arith.constant dense<0.000000e+00> : vector<64x128xf32>
    %268 = tpu.matmul %266, %267, %cst_94 {dimension_numbers = #tpu.dot_dimension_numbers<[1], [0], [0], [1], [0, 0, 1, 1], [], []>} : vector<64x128xbf16>, vector<128x128xbf16>, vector<64x128xf32> -> vector<64x128xf32>
    %c0_95 = arith.constant 0 : index
    %c0_96 = arith.constant 0 : index
    %269 = vector.load %arg9[%c0_95, %c0_96] : memref<1x128xf32, #tpu.memory_space<vmem>>, vector<1x128xf32>
    %270 = vector.broadcast %269 : vector<1x128xf32> to vector<64x128xf32>
    %271 = arith.addf %268, %270 : vector<64x128xf32>
    %c0_97 = arith.constant 0 : index
    %c0_98 = arith.constant 0 : index
    %272 = vector.load %arg10[%c0_97, %c0_98] : memref<64x128xf32, #tpu.memory_space<vmem>>, vector<64x128xf32>
    tpu.vector_store %arg10[%c0_97, %c0_98], %271 {strides = array<i32>} : memref<64x128xf32, #tpu.memory_space<vmem>>, vector<64x128xf32>,
    return
  }
}

</mosaic_0001>

<bundles_post_ra>
// kernel: mlp_lstm_critic_forward.1
= control target key start
LH: loop header
LB: loop body
LE: loop exit
PB: predicated region body
PF: predicated region fallthrough
CT: control target
= control target key end

     0   :  { %15 = vsyncpa [#allocation5], 0  ;;  %s5072_s0 = inlined_call_operand.hbm [shape: bf16[64,16], index: 0, kind: input, shape index: {}]   ;;  %s5073_s1 = inlined_call_operand.hbm [shape: f32[8,128], index: 1, kind: input, shape index: {}]   ;;  %s5074_s2 = inlined_call_operand.hbm [shape: f32[8,128], index: 2, kind: input, shape index: {}]   ;;  %s5075_s3 = inlined_call_operand.hbm [shape: bf16[16,128], index: 3, kind: input, shape index: {}]   ;;  %s5076_s4 = inlined_call_operand.hbm [shape: f32[1,128], index: 4, kind: input, shape index: {}]   ;;  %s5077_s5 = inlined_call_operand.hbm [shape: bf16[128,512], index: 5, kind: input, shape index: {}]   ;;  %s5078_s6 = inlined_call_operand.hbm [shape: bf16[128,512], index: 6, kind: input, shape index: {}]   ;;  %s5079_s7 = inlined_call_operand.hbm [shape: f32[1,512], index: 7, kind: input, shape index: {}]   ;;  %s5080_s8 = inlined_call_operand.hbm [shape: bf16[128,128], index: 8, kind: input, shape index: {}]   ;;  %s5081_s9 = inlined_call_operand.hbm [shape: f32[1,128], index: 9, kind: input, shape index: {}]   ;;  %s5082_s10 = inlined_call_operand.hbm [shape: f32[64,128], index: 10, kind: output, shape index: {}]  }
   0x1   :  { %16 = vsyncpa [#allocation8], 0 }
   0x2   :  { %17 = vsyncpa [#allocation11], 0 }
   0x3   :  { %18 = vsyncpa [#allocation14], 0 }
   0x4   :  { %19 = vsyncpa [#allocation17], 0 }
   0x5   :  { %20 = vsyncpa [#allocation20], 0 }
   0x6   :  { %21 = vsyncpa [#allocation6], 0  ;;  %s4297_s13 = smov [#allocation7]   ;;  %s4041_s17 = scalar_lea.hbm %s5073_s1, 128 }
   0x7   :  { %s40_s14 = sshll.u32 %s4297_s13, 4  ;;  %p4042_p0 = scmp.ne.s32.totalorder %s5073_s1, %s4041_s17  ;;  %s41_s14 = int_to_ptr.vmem [resolvable:$true] %s40_s14 }
   0x8   :  { %p4045_p1 = scmp.lt.u32.totalorder %s4041_s17, %s5073_s1 }
   0xa   :  { %p4047_p2 = pnand %p4045_p1, %p4042_p0 }
   0xc   :  { %4050 = shalt.err (!%p4047_p2)
}
   0xd   :  { %s4051_s22 = scalar_lea.vmem %s41_s14, 128  ;;  %p4056_p4 = scmp.lt.s32.totalorder %s41_s14, %s41_s14 }
   0xe   :  { %p4052_p3 = scmp.ne.s32.totalorder %s41_s14, %s4051_s22  ;;  %p4057_p5 = scmp.lt.s32.totalorder %s4051_s22, %s4051_s22 }
  0x10   :  { %p4058_p6 = por %p4057_p5, %p4056_p4 }
  0x12   :  { %p4059_p7 = pnand %p4058_p6, %p4052_p3 }
  0x14   :  { %4062 = shalt.err (!%p4059_p7)
}
  0x15   :  { %43 = dma.hbm_to_vmem [thread:$0]  %s5073_s1, 128, %s41_s14, [#allocation8]  }
  0x16   :  { %s4298_s25 = smov [#allocation10]   ;;  %s4299_s27 = smov [#allocation13]  }
  0x17   :  { %s59_s26 = sshll.u32 %s4298_s25, 4  ;;  %s81_s28 = sshll.u32 %s4299_s27, 4  ;;  %s60_s26 = int_to_ptr.vmem [resolvable:$true] %s59_s26  ;;  %s82_s28 = int_to_ptr.vmem [resolvable:$true] %s81_s28 }
  0x18   :  { %s4063_s11 = scalar_lea.hbm %s5075_s3, 128 }
  0x19   :  { %p4064_p8 = scmp.ne.s32.totalorder %s5075_s3, %s4063_s11  ;;  %p4067_p9 = scmp.lt.u32.totalorder %s4063_s11, %s5075_s3 }
  0x1b   :  { %p4069_p10 = pnand %p4067_p9, %p4064_p8 }
  0x1d   :  { %4072 = shalt.err (!%p4069_p10)
}
  0x1e   :  { %s4073_s1 = scalar_lea.vmem %s60_s26, 128  ;;  %p4078_p12 = scmp.lt.s32.totalorder %s60_s26, %s60_s26 }
  0x1f   :  { %p4074_p11 = scmp.ne.s32.totalorder %s60_s26, %s4073_s1  ;;  %p4079_p13 = scmp.lt.s32.totalorder %s4073_s1, %s4073_s1 }
  0x21   :  { %p4080_p0 = por %p4079_p13, %p4078_p12 }
  0x23   :  { %p4081_p1 = pnand %p4080_p0, %p4074_p11 }
  0x25   :  { %4084 = shalt.err (!%p4081_p1)
}
  0x26   :  { %s4300_s14 = smov 64   ;;  %s4301_s17 = smov 4  }
  0x27   :  { %65 = dma.hbm_to_vmem [thread:$0]  %s5075_s3, 128, %s60_s26, [#allocation11], %s4300_s14, %s4300_s14, %s4301_s17  }
  0x28   :  { %s4085_s22 = scalar_lea.hbm %s5077_s5, 4096 }
  0x29   :  { %p4086_p2 = scmp.ne.s32.totalorder %s5077_s5, %s4085_s22  ;;  %p4089_p3 = scmp.lt.u32.totalorder %s4085_s22, %s5077_s5 }
  0x2b   :  { %p4091_p4 = pnand %p4089_p3, %p4086_p2 }
  0x2d   :  { %4094 = shalt.err (!%p4091_p4)
}
  0x2e   :  { %s4095_s29 = scalar_lea.vmem %s82_s28, 4096  ;;  %p4100_p6 = scmp.lt.s32.totalorder %s82_s28, %s82_s28 }
  0x2f   :  { %p4096_p5 = scmp.ne.s32.totalorder %s82_s28, %s4095_s29  ;;  %p4101_p7 = scmp.lt.s32.totalorder %s4095_s29, %s4095_s29 }
  0x31   :  { %p4102_p8 = por %p4101_p7, %p4100_p6 }
  0x33   :  { %p4103_p9 = pnand %p4102_p8, %p4096_p5 }
  0x35   :  { %4106 = shalt.err (!%p4103_p9)
}
  0x36   :  { %s4302_s3 = smov 256   ;;  %s4303_s26 = smov 16  }
  0x37   :  { %87 = dma.hbm_to_vmem [thread:$0]  %s5077_s5, 4096, %s82_s28, [#allocation14], %s4302_s3, %s4302_s3, %s4303_s26  }
  0x38   :  { %s4304_s12 = smov [#allocation16]   ;;  %s4305_s15 = smov [#allocation4]  }
  0x39   :  { %s106_s13 = sshll.u32 %s4304_s12, 4  ;;  %s27_s16 = sshll.u32 %s4305_s15, 4  ;;  %s107_s13 = int_to_ptr.vmem [resolvable:$true] %s106_s13  ;;  %s28_s16 = int_to_ptr.vmem [resolvable:$true] %s27_s16 }
  0x3a   :  { %s4107_s19 = scalar_lea.hbm %s5079_s7, 64 }
  0x3b   :  { %p4108_p10 = scmp.ne.s32.totalorder %s5079_s7, %s4107_s19  ;;  %p4111_p11 = scmp.lt.u32.totalorder %s4107_s19, %s5079_s7 }
  0x3d   :  { %p4113_p12 = pnand %p4111_p11, %p4108_p10 }
  0x3f   :  { %4116 = shalt.err (!%p4113_p12)
}
  0x40   :  { %s4117_s5 = scalar_lea.vmem %s107_s13, 64  ;;  %p4122_p0 = scmp.lt.s32.totalorder %s107_s13, %s107_s13 }
  0x41   :  { %p4118_p13 = scmp.ne.s32.totalorder %s107_s13, %s4117_s5  ;;  %p4123_p1 = scmp.lt.s32.totalorder %s4117_s5, %s4117_s5 }
  0x43   :  { %p4124_p2 = por %p4123_p1, %p4122_p0 }
  0x45   :  { %p4125_p3 = pnand %p4124_p2, %p4118_p13 }
  0x47   :  { %4128 = shalt.err (!%p4125_p3)
}
  0x48   :  { %109 = dma.hbm_to_vmem [thread:$0]  %s5079_s7, 64, %s107_s13, [#allocation17]  }
  0x49   :  { %s4129_s29 = scalar_lea.hbm %s5072_s0, 512 }
  0x4a   :  { %p4130_p4 = scmp.ne.s32.totalorder %s5072_s0, %s4129_s29  ;;  %p4133_p5 = scmp.lt.u32.totalorder %s4129_s29, %s5072_s0 }
  0x4c   :  { %p4135_p6 = pnand %p4133_p5, %p4130_p4 }
  0x4e   :  { %4138 = shalt.err (!%p4135_p6)
}
  0x4f   :  { %s4139_s1 = scalar_lea.vmem %s28_s16, 512  ;;  %p4144_p8 = scmp.lt.s32.totalorder %s28_s16, %s28_s16 }
  0x50   :  { %p4140_p7 = scmp.ne.s32.totalorder %s28_s16, %s4139_s1  ;;  %p4145_p9 = scmp.lt.s32.totalorder %s4139_s1, %s4139_s1 }
  0x52   :  { %p4146_p10 = por %p4145_p9, %p4144_p8 }
  0x54   :  { %p4147_p11 = pnand %p4146_p10, %p4140_p7 }
  0x56   :  { %4150 = shalt.err (!%p4147_p11)
}
  0x57   :  { %33 = dma.hbm_to_vmem [thread:$0]  %s5072_s0, 512, %s28_s16, [#allocation5], %s4300_s14, %s4300_s14, %s4301_s17  }
  0x58   :  { %s4306_s18 = smov [#allocation9]   ;;  %s4307_s20 = smov [#allocation12]  }
  0x59   :  { %s50_s19 = sshll.u32 %s4306_s18, 4  ;;  %s72_s21 = sshll.u32 %s4307_s20, 4  ;;  %s51_s19 = int_to_ptr.vmem [resolvable:$true] %s50_s19  ;;  %s73_s21 = int_to_ptr.vmem [resolvable:$true] %s72_s21 }
  0x5a   :  { %s4151_s5 = scalar_lea.hbm %s5074_s2, 128 }
  0x5b   :  { %p4152_p12 = scmp.ne.s32.totalorder %s5074_s2, %s4151_s5  ;;  %p4155_p13 = scmp.lt.u32.totalorder %s4151_s5, %s5074_s2 }
  0x5d   :  { %p4157_p0 = pnand %p4155_p13, %p4152_p12 }
  0x5f   :  { %4160 = shalt.err (!%p4157_p0)
}
  0x60   :  { %s4161_s0 = scalar_lea.vmem %s51_s19, 128  ;;  %p4166_p2 = scmp.lt.s32.totalorder %s51_s19, %s51_s19 }
  0x61   :  { %p4162_p1 = scmp.ne.s32.totalorder %s51_s19, %s4161_s0  ;;  %p4167_p3 = scmp.lt.s32.totalorder %s4161_s0, %s4161_s0 }
  0x63   :  { %p4168_p4 = por %p4167_p3, %p4166_p2 }
  0x65   :  { %p4169_p5 = pnand %p4168_p4, %p4162_p1 }
  0x67   :  { %4172 = shalt.err (!%p4169_p5)
}
  0x68   :  { %53 = dma.hbm_to_vmem [thread:$0]  %s5074_s2, 128, %s51_s19, [#allocation8]  }
  0x69   :  { %s4173_s12 = scalar_lea.hbm %s5076_s4, 16 }
  0x6a   :  { %p4174_p6 = scmp.ne.s32.totalorder %s5076_s4, %s4173_s12  ;;  %p4177_p7 = scmp.lt.u32.totalorder %s4173_s12, %s5076_s4 }
  0x6c   :  { %p4179_p8 = pnand %p4177_p7, %p4174_p6 }
  0x6e   :  { %4182 = shalt.err (!%p4179_p8)
}
  0x6f   :  { %s4183_s18 = scalar_lea.vmem %s73_s21, 16  ;;  %s4187_s20 = scalar_lea.vmem %s73_s21, 32 }
  0x70   :  { %p4184_p9 = scmp.ne.s32.totalorder %s73_s21, %s4183_s18  ;;  %p4188_p10 = scmp.lt.s32.totalorder %s73_s21, %s73_s21 }
  0x71   :  { %p4189_p11 = scmp.lt.s32.totalorder %s4187_s20, %s4183_s18 }
  0x73   :  { %p4190_p12 = por %p4189_p11, %p4188_p10 }
  0x75   :  { %p4191_p13 = pnand %p4190_p12, %p4184_p9 }
  0x77   :  { %4194 = shalt.err (!%p4191_p13)
}
  0x78   :  { %75 = dma.hbm_to_vmem [thread:$0]  %s5076_s4, 16, %s73_s21, [#allocation11]  }
  0x79   :  { %s4308_s22 = smov [#allocation15]   ;;  %s4309_s5 = smov [#allocation18]  }
  0x7a   :  { %s93_s23 = sshll.u32 %s4308_s22, 4  ;;  %s115_s28 = sshll.u32 %s4309_s5, 4  ;;  %s94_s23 = int_to_ptr.vmem [resolvable:$true] %s93_s23  ;;  %s116_s28 = int_to_ptr.vmem [resolvable:$true] %s115_s28 }
  0x7b   :  { %s4195_s27 = scalar_lea.hbm %s5078_s6, 4096 }
  0x7c   :  { %p4196_p0 = scmp.ne.s32.totalorder %s5078_s6, %s4195_s27  ;;  %p4199_p1 = scmp.lt.u32.totalorder %s4195_s27, %s5078_s6 }
  0x7e   :  { %p4201_p2 = pnand %p4199_p1, %p4196_p0 }
  0x80   :  { %4204 = shalt.err (!%p4201_p2)
}
  0x81   :  { %s4205_s4 = scalar_lea.vmem %s94_s23, 4096  ;;  %p4210_p4 = scmp.lt.s32.totalorder %s94_s23, %s94_s23 }
  0x82   :  { %p4206_p3 = scmp.ne.s32.totalorder %s94_s23, %s4205_s4  ;;  %p4211_p5 = scmp.lt.s32.totalorder %s4205_s4, %s4205_s4 }
  0x84   :  { %p4212_p6 = por %p4211_p5, %p4210_p4 }
  0x86   :  { %p4213_p7 = pnand %p4212_p6, %p4206_p3 }
  0x88   :  { %4216 = shalt.err (!%p4213_p7)
}
  0x89   :  { %99 = dma.hbm_to_vmem [thread:$0]  %s5078_s6, 4096, %s94_s23, [#allocation14], %s4302_s3, %s4302_s3, %s4303_s26  }
  0x8a   :  { %s4217_s1 = scalar_lea.hbm %s5080_s8, 1024 }
  0x8b   :  { %p4218_p8 = scmp.ne.s32.totalorder %s5080_s8, %s4217_s1  ;;  %p4221_p9 = scmp.lt.u32.totalorder %s4217_s1, %s5080_s8 }
  0x8d   :  { %p4223_p10 = pnand %p4221_p9, %p4218_p8 }
  0x8f   :  { %4226 = shalt.err (!%p4223_p10)
}
  0x90   :  { %s4227_s2 = scalar_lea.vmem %s116_s28, 1024  ;;  %p4232_p12 = scmp.lt.s32.totalorder %s116_s28, %s116_s28 }
  0x91   :  { %p4228_p11 = scmp.ne.s32.totalorder %s116_s28, %s4227_s2  ;;  %p4233_p13 = scmp.lt.s32.totalorder %s4227_s2, %s4227_s2 }
  0x93   :  { %p4234_p0 = por %p4233_p13, %p4232_p12 }
  0x95   :  { %p4235_p1 = pnand %p4234_p0, %p4228_p11 }
  0x97   :  { %4238 = shalt.err (!%p4235_p1)
}
  0x98   :  { %121 = dma.hbm_to_vmem [thread:$0]  %s5080_s8, 1024, %s116_s28, [#allocation17], %s4300_s14, %s4300_s14, %s4301_s17  }
  0x99   :  { %s4310_s26 = smov [#allocation19]   ;;  %s4239_s5 = scalar_lea.hbm %s5081_s9, 16 }
  0x9a   :  { %s128_s19 = sshll.u32 %s4310_s26, 4  ;;  %p4240_p2 = scmp.ne.s32.totalorder %s5081_s9, %s4239_s5  ;;  %s129_s19 = int_to_ptr.vmem [resolvable:$true] %s128_s19 }
  0x9b   :  { %p4243_p3 = scmp.lt.u32.totalorder %s4239_s5, %s5081_s9 }
  0x9d   :  { %p4245_p4 = pnand %p4243_p3, %p4240_p2 }
  0x9f   :  { %4248 = shalt.err (!%p4245_p4)
}
  0xa0   :  { %s4249_s16 = scalar_lea.vmem %s129_s19, 16  ;;  %s4253_s8 = scalar_lea.vmem %s129_s19, 32 }
  0xa1   :  { %p4250_p5 = scmp.ne.s32.totalorder %s129_s19, %s4249_s16  ;;  %p4254_p6 = scmp.lt.s32.totalorder %s129_s19, %s129_s19 }
  0xa2   :  { %p4255_p7 = scmp.lt.s32.totalorder %s4253_s8, %s4249_s16 }
  0xa4   :  { %p4256_p8 = por %p4255_p7, %p4254_p6 }
  0xa6   :  { %p4257_p9 = pnand %p4256_p8, %p4250_p5 }
  0xa8   :  { %4260 = shalt.err (!%p4257_p9)
}
  0xa9   :  { %131 = dma.hbm_to_vmem [thread:$0]  %s5081_s9, 16, %s129_s19, [#allocation20]  }
  0xaa   :  { %4283 = dma.done.wait [#allocation5], 512  }
  0xab   :  { %4284 = vsyncadd [#allocation5], 4294966784 }
  0xac   :  { %4285 = dma.done.wait [#allocation8], 256  }
  0xad   :  { %4286 = vsyncadd [#allocation8], 4294967040 }
  0xae   :  { %4287 = dma.done.wait [#allocation11], 144  }
  0xaf   :  { %4288 = vsyncadd [#allocation11], 4294967152 }
  0xb0   :  { %4289 = dma.done.wait [#allocation14], 8192  }
  0xb1   :  { %4290 = vsyncadd [#allocation14], 4294959104 }
  0xb2   :  { %4291 = dma.done.wait [#allocation17], 1088  }
  0xb3   :  { %4292 = vsyncadd [#allocation17], 4294966208 }
  0xb4   :  { %4293 = dma.done.wait [#allocation20], 16  }
  0xb5   :  { %4294 = vsyncadd [#allocation20], 4294967280  ;;  %v3732_v0 = vld [vmem:[#allocation10] sm:$0xff]   ;;  %vm206_vm0 = vcmask 130048   ;;  %v3733_v1 = vld [vmem:[#allocation4] sm:$0xff]   ;;  %v5083_v38 = vmov 0  }
  0xb6   :  { %3680 = vmatprep.subr.bf16.mxu1 %v3732_v0  ;;  %v3734_v2 = vld [vmem:[#allocation4 + $0x8] sm:$0xff]   ;;  %3682 = vmatprep.mubr.msk.bf16.mxu1 %vm206_vm0, %v3733_v1  ;;  %v3735_v3 = vld [vmem:[#allocation4 + $0x10] sm:$0xff]   ;;  %v3736_v10 = vld [vmem:[#allocation4 + $0x18] sm:$0xff]   ;;  %s4312_s9 = smov [#allocation21]  }
  0xb7   :  { %3681 = vmatpush3.bf16.msra.mxu1 %v3732_v0  ;;  %v3737_v4 = vld [vmem:[#allocation13 + $0x4] ss:$16 sps:$4 sm:$0xff]   ;;  %v3739_v5 = vld [vmem:[#allocation13] ss:$16 sps:$4 sm:$0xff]   ;;  %v3787_v37 = vld [vmem:[#allocation13 + $0xc] ss:$16 sps:$4 sm:$0xff]   ;;  %542 = vmatprep.mubr.bf16.mxu0 %v5083_v38 }
  0xb8   :  { %510 = vmatprep.subr.bf16.mxu0 %v3737_v4  ;;  %v4508_v6 = vld [vmem:[#allocation15] ss:$16 sps:$4 sm:$0xff]   ;;  %v4510_v7 = vld [vmem:[#allocation15 + $0x4] ss:$16 sps:$4 sm:$0xff]   ;;  %v3332_v41 = vld [vmem:[#allocation12] ss:$0 sm:$0xff] }
  0xb9   :  { %511 = vmatpush1.bf16.msra.mxu0 %v3739_v5  ;;  %v3743_v8 = vld [vmem:[#allocation13 + $0x24] ss:$16 sps:$4 sm:$0xff]   ;;  %v3745_v9 = vld [vmem:[#allocation13 + $0x20] ss:$16 sps:$4 sm:$0xff]   ;;  %887 = vmatprep.subr.bf16.mxu1 %v4510_v7  ;;  %v3785_v55 = vld [vmem:[#allocation13 + $0x8] ss:$16 sps:$4 sm:$0xff]  }
  0xba   :  { %3683 = vmatmul.mubr.msk.bf16.vlgmr.msra.gmra.mrb[0].mxu1 %vm206_vm0, %v3734_v2  ;;  %512 = vmatprep.subr.bf16.mxu0 %v3743_v8  ;;  %v4514_v11 = vld [vmem:[#allocation15 + $0x24] ss:$16 sps:$4 sm:$0xff]   ;;  %v4516_v12 = vld [vmem:[#allocation15 + $0x20] ss:$16 sps:$4 sm:$0xff]   ;;  %v3790_v58 = vld [vmem:[#allocation13 + $0x2c] ss:$16 sps:$4 sm:$0xff]  }
  0xbb   :  { %3686 = vmatprep.mubr.msk.bf16.mxu1 %vm206_vm0, %v3735_v3  ;;  %888 = vmatpush1.bf16.msra.mxu1 %v4508_v6  ;;  %v3749_v13 = vld [vmem:[#allocation13 + $0x44] ss:$16 sps:$4 sm:$0xff]   ;;  %v3751_v14 = vld [vmem:[#allocation13 + $0x40] ss:$16 sps:$4 sm:$0xff]   ;;  %v3788_v0 = vld [vmem:[#allocation13 + $0x28] ss:$16 sps:$4 sm:$0xff]  }
  0xbc   :  { %889 = vmatprep.subr.bf16.mxu1 %v4514_v11  ;;  %v4519_v15 = vld [vmem:[#allocation15 + $0x44] ss:$16 sps:$4 sm:$0xff]   ;;  %v4523_v17 = vld [vmem:[#allocation15 + $0x40] ss:$16 sps:$4 sm:$0xff]   ;;  %v3793_v5 = vld [vmem:[#allocation13 + $0x4c] ss:$16 sps:$4 sm:$0xff]  }
  0xbd   :  { %513 = vmatpush1.bf16.msra.mxu0 %v3745_v9  ;;  %v3755_v16 = vld [vmem:[#allocation13 + $0x64] ss:$16 sps:$4 sm:$0xff]   ;;  %v3757_v18 = vld [vmem:[#allocation13 + $0x60] ss:$16 sps:$4 sm:$0xff]   ;;  %s3315_s28 = sshll.u32 %s4312_s9, 4  ;;  %s3316_s28 = int_to_ptr.vmem [resolvable:$true] %s3315_s28 }
  0xbe   :  { %514 = vmatprep.subr.bf16.mxu0 %v3749_v13  ;;  %v4526_v19 = vld [vmem:[#allocation15 + $0x64] ss:$16 sps:$4 sm:$0xff]   ;;  %v4528_v20 = vld [vmem:[#allocation15 + $0x60] ss:$16 sps:$4 sm:$0xff]   ;;  %s4261_s29 = scalar_lea.vmem %s3316_s28, 1024  ;;  %p4266_p11 = scmp.lt.s32.totalorder %s3316_s28, %s3316_s28 }
  0xbf   :  { %890 = vmatpush1.bf16.msra.mxu1 %v4516_v12  ;;  %v3761_v21 = vld [vmem:[#allocation13 + $0x84] ss:$16 sps:$4 sm:$0xff]   ;;  %v3763_v22 = vld [vmem:[#allocation13 + $0x80] ss:$16 sps:$4 sm:$0xff]   ;;  %p4262_p10 = scmp.ne.s32.totalorder %s3316_s28, %s4261_s29  ;;  %p4267_p12 = scmp.lt.s32.totalorder %s4261_s29, %s4261_s29 }
  0xc0   :  { %891 = vmatprep.subr.bf16.mxu1 %v4519_v15  ;;  %v4531_v23 = vld [vmem:[#allocation15 + $0x84] ss:$16 sps:$4 sm:$0xff]   ;;  %v4534_v25 = vld [vmem:[#allocation15 + $0x80] ss:$16 sps:$4 sm:$0xff]  }
  0xc1   :  { %515 = vmatpush1.bf16.msra.mxu0 %v3751_v14  ;;  %v3767_v24 = vld [vmem:[#allocation13 + $0xa4] ss:$16 sps:$4 sm:$0xff]   ;;  %v3769_v26 = vld [vmem:[#allocation13 + $0xa0] ss:$16 sps:$4 sm:$0xff]   ;;  %v3796_v14 = vld [vmem:[#allocation13 + $0x6c] ss:$16 sps:$4 sm:$0xff]   ;;  %p4268_p13 = por %p4267_p12, %p4266_p11 }
  0xc2   :  { %3687 = vmatmul.mubr.msk.bf16.gmra.mrb[4].mxu1 %vm206_vm0, %v3736_v10  ;;  %516 = vmatprep.subr.bf16.mxu0 %v3755_v16  ;;  %v4539_v27 = vld [vmem:[#allocation15 + $0xa4] ss:$16 sps:$4 sm:$0xff]   ;;  %v4541_v28 = vld [vmem:[#allocation15 + $0xa0] ss:$16 sps:$4 sm:$0xff]   ;;  %v3791_v10 = vld [vmem:[#allocation13 + $0x48] ss:$16 sps:$4 sm:$0xff]  }
  0xc3   :  { %892 = vmatpush1.bf16.msra.mxu1 %v4523_v17  ;;  %v3773_v29 = vld [vmem:[#allocation13 + $0xc4] ss:$16 sps:$4 sm:$0xff]   ;;  %v3775_v30 = vld [vmem:[#allocation13 + $0xc0] ss:$16 sps:$4 sm:$0xff]   ;;  %919 = vmatprep.mubr.bf16.mxu1 %v5083_v38  ;;  %v3794_v16 = vld [vmem:[#allocation13 + $0x68] ss:$16 sps:$4 sm:$0xff]   ;;  %p4269_p0 = pnand %p4268_p13, %p4262_p10 }
  0xc4   :  { %893 = vmatprep.subr.bf16.mxu1 %v4526_v19  ;;  %v4545_v31 = vld [vmem:[#allocation15 + $0xc4] ss:$16 sps:$4 sm:$0xff]   ;;  %v4547_v32 = vld [vmem:[#allocation15 + $0xc0] ss:$16 sps:$4 sm:$0xff]  }
  0xc5   :  { %517 = vmatpush1.bf16.msra.mxu0 %v3757_v18  ;;  %v3779_v33 = vld [vmem:[#allocation13 + $0xe4] ss:$16 sps:$4 sm:$0xff]   ;;  %v3781_v34 = vld [vmem:[#allocation13 + $0xe0] ss:$16 sps:$4 sm:$0xff]   ;;  %v3799_v18 = vld [vmem:[#allocation13 + $0x8c] ss:$16 sps:$4 sm:$0xff]  }
  0xc6   :  { %518 = vmatprep.subr.bf16.mxu0 %v3761_v21  ;;  %v4551_v35 = vld [vmem:[#allocation15 + $0xe4] ss:$16 sps:$4 sm:$0xff]   ;;  %v4553_v36 = vld [vmem:[#allocation15 + $0xe0] ss:$16 sps:$4 sm:$0xff]   ;;  %v3797_v21 = vld [vmem:[#allocation13 + $0x88] ss:$16 sps:$4 sm:$0xff]  }
  0xc7   :  { %894 = vmatpush1.bf16.msra.mxu1 %v4528_v20  ;;  %v688_v39 = vld [vmem:[#allocation7] sm:$0xff] }
  0xc8   :  { %895 = vmatprep.subr.bf16.mxu1 %v4531_v23  ;;  %v4559_v40 = vpack.c.bf16 %v688_v39, %v688_v39  ;;  %v4595_v39 = vld [vmem:[#allocation15 + $0x2c] ss:$16 sps:$4 sm:$0xff]  }
  0xc9   :  { %519 = vmatpush1.bf16.msra.mxu0 %v3763_v22  ;;  %v3802_v22 = vld [vmem:[#allocation13 + $0xac] ss:$16 sps:$4 sm:$0xff]  }
  0xca   :  { %520 = vmatprep.subr.bf16.mxu0 %v3767_v24  ;;  %v3800_v24 = vld [vmem:[#allocation13 + $0xa8] ss:$16 sps:$4 sm:$0xff]  }
  0xcb   :  { %896 = vmatpush1.bf16.msra.mxu1 %v4534_v25 }
  0xcc   :  { %897 = vmatprep.subr.bf16.mxu1 %v4539_v27 }
  0xcd   :  { %521 = vmatpush1.bf16.msra.mxu0 %v3769_v26  ;;  %v3805_v26 = vld [vmem:[#allocation13 + $0xcc] ss:$16 sps:$4 sm:$0xff]  }
  0xce   :  { %522 = vmatprep.subr.bf16.mxu0 %v3773_v29  ;;  %v3803_v29 = vld [vmem:[#allocation13 + $0xc8] ss:$16 sps:$4 sm:$0xff]  }
  0xcf   :  { %898 = vmatpush1.bf16.msra.mxu1 %v4541_v28 }
  0xd0   :  { %899 = vmatprep.subr.bf16.mxu1 %v4545_v31 }
  0xd1   :  { %523 = vmatpush1.bf16.msra.mxu0 %v3775_v30  ;;  %v3808_v30 = vld [vmem:[#allocation13 + $0xec] ss:$16 sps:$4 sm:$0xff]  }
  0xd2   :  { %524 = vmatprep.subr.bf16.mxu0 %v3779_v33  ;;  %v3806_v33 = vld [vmem:[#allocation13 + $0xe8] ss:$16 sps:$4 sm:$0xff]  }
  0xd3   :  { %900 = vmatpush1.bf16.msra.mxu1 %v4547_v32 }
  0xd4   :  { %901 = vmatprep.subr.bf16.mxu1 %v4551_v35 }
  0xd5   :  { %525 = vmatpush1.bf16.msra.mxu0 %v3781_v34  ;;  %v4590_v34 = vld [vmem:[#allocation15 + $0xc] ss:$16 sps:$4 sm:$0xff]  }
  0xd6   :  { %583 = vmatprep.subr.bf16.mxu0 %v3787_v37  ;;  %v4592_v37 = vld [vmem:[#allocation15 + $0x8] ss:$16 sps:$4 sm:$0xff]  }
  0xd7   :  { %902 = vmatpush1.bf16.msra.mxu1 %v4553_v36 }
  0xd8   :  { %1195 = vmatprep.subr.bf16.mxu1 %v4510_v7 }
  0xda   :  { %920 = vmatmul.mubr.bf16.vlgmr.msra.gmra.mrb[8].mxu1 %v4559_v40 }
  0xdb   :  { %1196 = vmatpush1.bf16.msra.mxu1 %v4508_v6  ;;  %1227 = vmatprep.mubr.bf16.mxu1 %v5083_v38 }
  0xdc   :  { %1197 = vmatprep.subr.bf16.mxu1 %v4514_v11 }
  0xdf   :  { %1198 = vmatpush1.bf16.msra.mxu1 %v4516_v12 }
  0xe0   :  { %1199 = vmatprep.subr.bf16.mxu1 %v4519_v15 }
  0xe3   :  { %1200 = vmatpush1.bf16.msra.mxu1 %v4523_v17 }
  0xe4   :  { %1201 = vmatprep.subr.bf16.mxu1 %v4526_v19 }
  0xe7   :  { %1202 = vmatpush1.bf16.msra.mxu1 %v4528_v20 }
  0xe8   :  { %1203 = vmatprep.subr.bf16.mxu1 %v4531_v23 }
  0xeb   :  { %1204 = vmatpush1.bf16.msra.mxu1 %v4534_v25 }
  0xec   :  { %1205 = vmatprep.subr.bf16.mxu1 %v4539_v27 }
  0xef   :  { %1206 = vmatpush1.bf16.msra.mxu1 %v4541_v28 }
  0xf0   :  { %1207 = vmatprep.subr.bf16.mxu1 %v4545_v31 }
  0xf3   :  { %1208 = vmatpush1.bf16.msra.mxu1 %v4547_v32 }
  0xf4   :  { %1209 = vmatprep.subr.bf16.mxu1 %v4551_v35 }
  0xf7   :  { %1210 = vmatpush1.bf16.msra.mxu1 %v4553_v36 }
  0xf8   :  { %1503 = vmatprep.subr.bf16.mxu1 %v4510_v7 }
 0x18d   :  { %v3684_v42 = vpop.f32.mrb[0].mxu1 }
 0x18e   :  { %v262_v43 = vadd.f32 %v3684_v42, %v3332_v41  ;;  %v253_v44 = vpop.f32.mrb[1].mxu1  ;;  %v4602_v42 = vld [vmem:[#allocation15 + $0x4c] ss:$16 sps:$4 sm:$0xff]  }
 0x18f   :  { %v254_v45 = vadd.f32 %v3332_v41, %v253_v44  ;;  %v3685_v46 = vpop.f32.mrb[2].mxu1  ;;  %v4608_v44 = vld [vmem:[#allocation15 + $0x6c] ss:$16 sps:$4 sm:$0xff]  }
 0x190   :  { %v265_v47 = vadd.f32 %v3685_v46, %v3332_v41  ;;  %v256_v48 = vpop.f32.mrb[3].mxu1  ;;  %v286_v50 = vmax.f32 %v262_v43, 0.0  ;;  %v4605_v43 = vld [vmem:[#allocation15 + $0x48] ss:$16 sps:$4 sm:$0xff]   ;;  %v4616_v46 = vld [vmem:[#allocation15 + $0x8c] ss:$16 sps:$4 sm:$0xff]  }
 0x191   :  { %v257_v49 = vadd.f32 %v3332_v41, %v256_v48  ;;  %v284_v52 = vmax.f32 %v254_v45, 0.0  ;;  %v4612_v45 = vld [vmem:[#allocation15 + $0x68] ss:$16 sps:$4 sm:$0xff]   ;;  %v4622_v48 = vld [vmem:[#allocation15 + $0xac] ss:$16 sps:$4 sm:$0xff]  }
 0x192   :  { %v287_v51 = vmax.f32 %v265_v47, 0.0  ;;  %v4619_v47 = vld [vmem:[#allocation15 + $0x88] ss:$16 sps:$4 sm:$0xff]  }
 0x193   :  { %v285_v53 = vmax.f32 %v257_v49, 0.0  ;;  %v4625_v49 = vld [vmem:[#allocation15 + $0xa8] ss:$16 sps:$4 sm:$0xff]  }
 0x194   :  { %v4580_v54 = vpack.c.bf16 %v287_v51, %v286_v50  ;;  %v4629_v50 = vld [vmem:[#allocation15 + $0xcc] ss:$16 sps:$4 sm:$0xff]   ;;  %v4632_v51 = vld [vmem:[#allocation15 + $0xc8] ss:$16 sps:$4 sm:$0xff]  }
 0x195   :  { %v292_v56 = vpack.c.bf16 %v285_v53, %v284_v52  ;;  %v3688_v57 = vpop.f32.mrb[4].mxu1  ;;  %v4635_v52 = vld [vmem:[#allocation15 + $0xec] ss:$16 sps:$4 sm:$0xff]   ;;  %v4639_v53 = vld [vmem:[#allocation15 + $0xe8] ss:$16 sps:$4 sm:$0xff]  }
 0x196   :  { %v278_v59 = vadd.f32 %v3688_v57, %v3332_v41  ;;  %v269_v60 = vpop.f32.mrb[5].mxu1  ;;  %v330_v57 = vlaneseq }
 0x197   :  { %543 = vmatmul.mubr.bf16.vlgmr.msra.gmra.mrb[0].mxu0 %v292_v56  ;;  %v270_v61 = vadd.f32 %v3332_v41, %v269_v60  ;;  %v3689_v62 = vpop.f32.mrb[6].mxu1  ;;  %v328_v60 = vld [vmem:[#allocation16] sm:$0xf] }
 0x198   :  { %584 = vmatpush1.bf16.msra.mxu0 %v3785_v55  ;;  %v290_v63 = vmax.f32 %v278_v59, 0.0  ;;  %v281_v1 = vadd.f32 %v3689_v62, %v3332_v41  ;;  %v272_v2 = vpop.f32.mrb[7].mxu1  ;;  %552 = vmatprep.mubr.bf16.mxu0 %v5083_v38 }
 0x199   :  { %585 = vmatprep.subr.bf16.mxu0 %v3790_v58  ;;  %v288_v3 = vmax.f32 %v270_v61, 0.0  ;;  %v273_v4 = vadd.f32 %v3332_v41, %v272_v2  ;;  %v4598_v41 = vld [vmem:[#allocation15 + $0x28] ss:$16 sps:$4 sm:$0xff]   ;;  %v331_v58 = vshrl.u32 %v330_v57, 7 }
 0x19a   :  { %v291_v7 = vmax.f32 %v281_v1, 0.0 }
 0x19b   :  { %v289_v8 = vmax.f32 %v273_v4, 0.0  ;;  %v332_v59 = vsub.s32 0, %v331_v58  ;;  %v336_v61 = vsub.s32 1, %v331_v58 }
 0x19c   :  { %586 = vmatpush1.bf16.msra.mxu0 %v3788_v0  ;;  %v4583_v9 = vpack.c.bf16 %v291_v7, %v290_v63 }
 0x19d   :  { %v294_v13 = vpack.c.bf16 %v289_v8, %v288_v3  ;;  %587 = vmatprep.subr.bf16.mxu0 %v3793_v5  ;;  %v333_v62 = vrot.slane %v328_v60, %v332_v59  ;;  %v337_v63 = vrot.slane %v328_v60, %v336_v61 }
 0x19f   :  { %553 = vmatmul.mubr.bf16.gmra.mrb[4].mxu0 %v4580_v54 }
 0x1a0   :  { %588 = vmatpush1.bf16.msra.mxu0 %v3791_v10  ;;  %562 = vmatprep.mubr.bf16.mxu0 %v5083_v38 }
 0x1a1   :  { %589 = vmatprep.subr.bf16.mxu0 %v3796_v14 }
 0x1a4   :  { %590 = vmatpush1.bf16.msra.mxu0 %v3794_v16 }
 0x1a5   :  { %591 = vmatprep.subr.bf16.mxu0 %v3799_v18 }
 0x1a7   :  { %563 = vmatmul.mubr.bf16.gmra.mrb[8].mxu0 %v294_v13 }
 0x1a8   :  { %592 = vmatpush1.bf16.msra.mxu0 %v3797_v21  ;;  %572 = vmatprep.mubr.bf16.mxu0 %v5083_v38 }
 0x1a9   :  { %593 = vmatprep.subr.bf16.mxu0 %v3802_v22 }
 0x1ac   :  { %594 = vmatpush1.bf16.msra.mxu0 %v3800_v24 }
 0x1ad   :  { %595 = vmatprep.subr.bf16.mxu0 %v3805_v26 }
 0x1af   :  { %573 = vmatmul.mubr.bf16.gmra.mrb[12].mxu0 %v4583_v9 }
 0x1b0   :  { %596 = vmatpush1.bf16.msra.mxu0 %v3803_v29  ;;  %615 = vmatprep.mubr.bf16.mxu0 %v5083_v38 }
 0x1b1   :  { %597 = vmatprep.subr.bf16.mxu0 %v3808_v30 }
 0x1b4   :  { %598 = vmatpush1.bf16.msra.mxu0 %v3806_v33 }
 0x1b5   :  { %928 = vmatprep.subr.bf16.mxu0 %v4590_v34 }
 0x1b7   :  { %616 = vmatmul.mubr.bf16.vlgmr.msra.gmra.mrb[16].mxu0 %v292_v56 }
 0x1b8   :  { %929 = vmatpush1.bf16.msra.mxu0 %v4592_v37  ;;  %625 = vmatprep.mubr.bf16.mxu0 %v5083_v38 }
 0x1b9   :  { %930 = vmatprep.subr.bf16.mxu0 %v4595_v39 }
 0x1bc   :  { %931 = vmatpush1.bf16.msra.mxu0 %v4598_v41 }
 0x1bd   :  { %932 = vmatprep.subr.bf16.mxu0 %v4602_v42 }
 0x1bf   :  { %626 = vmatmul.mubr.bf16.gmra.mrb[20].mxu0 %v4580_v54 }
 0x1c0   :  { %933 = vmatpush1.bf16.msra.mxu0 %v4605_v43  ;;  %635 = vmatprep.mubr.bf16.mxu0 %v5083_v38 }
 0x1c1   :  { %934 = vmatprep.subr.bf16.mxu0 %v4608_v44 }
 0x1c4   :  { %935 = vmatpush1.bf16.msra.mxu0 %v4612_v45 }
 0x1c5   :  { %936 = vmatprep.subr.bf16.mxu0 %v4616_v46 }
 0x1c7   :  { %636 = vmatmul.mubr.bf16.gmra.mrb[24].mxu0 %v294_v13 }
 0x1c8   :  { %937 = vmatpush1.bf16.msra.mxu0 %v4619_v47  ;;  %645 = vmatprep.mubr.bf16.mxu0 %v5083_v38 }
 0x1c9   :  { %938 = vmatprep.subr.bf16.mxu0 %v4622_v48 }
 0x1cc   :  { %939 = vmatpush1.bf16.msra.mxu0 %v4625_v49 }
 0x1cd   :  { %940 = vmatprep.subr.bf16.mxu0 %v4629_v50 }
 0x1cf   :  { %646 = vmatmul.mubr.bf16.gmra.mrb[28].mxu0 %v4583_v9 }
 0x1d0   :  { %941 = vmatpush1.bf16.msra.mxu0 %v4632_v51  ;;  %960 = vmatprep.mubr.bf16.mxu0 %v5083_v38 }
 0x1d1   :  { %942 = vmatprep.subr.bf16.mxu0 %v4635_v52 }
 0x1d4   :  { %943 = vmatpush1.bf16.msra.mxu0 %v4639_v53 }
 0x1d5   :  { %1236 = vmatprep.subr.bf16.mxu0 %v4590_v34 }
 0x1d7   :  { %961 = vmatmul.mubr.bf16.vlgmr.msra.gmra.mrb[32].mxu0 %v4559_v40  ;;  %v921_v40 = vpop.f32.mrb[8].mxu1 }
 0x1d8   :  { %1237 = vmatpush1.bf16.msra.mxu0 %v4592_v37  ;;  %1268 = vmatprep.mubr.bf16.mxu0 %v5083_v38  ;;  %v923_v54 = vpop.f32.mrb[9].mxu1 }
 0x1d9   :  { %1238 = vmatprep.subr.bf16.mxu0 %v4595_v39  ;;  %v925_v55 = vpop.f32.mrb[10].mxu1 }
 0x1da   :  { %v926_v56 = vpop.f32.mrb[11].mxu1 }
 0x1dc   :  { %1239 = vmatpush1.bf16.msra.mxu0 %v4598_v41 }
 0x1dd   :  { %1240 = vmatprep.subr.bf16.mxu0 %v4602_v42 }
 0x1e0   :  { %1241 = vmatpush1.bf16.msra.mxu0 %v4605_v43 }
 0x1e1   :  { %1242 = vmatprep.subr.bf16.mxu0 %v4608_v44 }
 0x1e4   :  { %1243 = vmatpush1.bf16.msra.mxu0 %v4612_v45 }
 0x1e5   :  { %1244 = vmatprep.subr.bf16.mxu0 %v4616_v46 }
 0x1e8   :  { %1245 = vmatpush1.bf16.msra.mxu0 %v4619_v47 }
 0x1e9   :  { %1246 = vmatprep.subr.bf16.mxu0 %v4622_v48 }
 0x1ec   :  { %1247 = vmatpush1.bf16.msra.mxu0 %v4625_v49 }
 0x1ed   :  { %1248 = vmatprep.subr.bf16.mxu0 %v4629_v50 }
 0x1f0   :  { %1249 = vmatpush1.bf16.msra.mxu0 %v4632_v51 }
 0x1f1   :  { %1250 = vmatprep.subr.bf16.mxu0 %v4635_v52 }
 0x1f4   :  { %1251 = vmatpush1.bf16.msra.mxu0 %v4639_v53 }
 0x1f5   :  { %1544 = vmatprep.subr.bf16.mxu0 %v4590_v34 }
 0x26a   :  { %v544_v0 = vpop.f32.mrb[0].mxu0 }
 0x26b   :  { %v545_v1 = vadd.f32 %v544_v0, %v333_v62  ;;  %v546_v2 = vpop.f32.mrb[1].mxu0 }
 0x26c   :  { %v547_v3 = vadd.f32 %v546_v2, %v337_v63  ;;  %v548_v4 = vpop.f32.mrb[2].mxu0 }
 0x26d   :  { %v4663_v5 = vadd.f32 %v548_v4, %v333_v62  ;;  %v969_v7 = vadd.f32 %v921_v40, %v545_v1  ;;  %v550_v8 = vpop.f32.mrb[3].mxu0 }
 0x26e   :  { %v4665_v9 = vadd.f32 %v550_v8, %v337_v63  ;;  %v970_v10 = vadd.f32 %v923_v54, %v547_v3 }
 0x272   :  { %v554_v13 = vpop.f32.mrb[4].mxu0 }
 0x273   :  { %v4667_v14 = vadd.f32 %v554_v13, %v333_v62  ;;  %v556_v16 = vpop.f32.mrb[5].mxu0  ;;  %v340_v13 = vsub.s32 2, %v331_v58 }
 0x274   :  { %v4669_v18 = vadd.f32 %v556_v16, %v337_v63  ;;  %v558_v21 = vpop.f32.mrb[6].mxu0  ;;  %v344_v16 = vsub.s32 3, %v331_v58 }
 0x275   :  { %v4671_v22 = vadd.f32 %v558_v21, %v333_v62  ;;  %v560_v24 = vpop.f32.mrb[7].mxu0 }
 0x276   :  { %v4673_v26 = vadd.f32 %v560_v24, %v337_v63  ;;  %v341_v24 = vrot.slane %v328_v60, %v340_v13 }
 0x27a   :  { %v564_v29 = vpop.f32.mrb[8].mxu0 }
 0x27b   :  { %v4675_v30 = vadd.f32 %v564_v29, %v333_v62  ;;  %v566_v33 = vpop.f32.mrb[9].mxu0 }
 0x27c   :  { %v4677_v40 = vadd.f32 %v566_v33, %v337_v63  ;;  %v568_v55 = vpop.f32.mrb[10].mxu0  ;;  %v345_v33 = vrot.slane %v328_v60, %v344_v16  ;;  %v3406_v60 = vmul.f32 -1.442695, %v969_v7 }
 0x27d   :  { %5085 = vst [vmem:[#allocation29_spill] sm:$0xff] %v4675_v30  ;;  %v4679_v54 = vadd.f32 %v568_v55, %v333_v62  ;;  %v570_v56 = vpop.f32.mrb[11].mxu0 }
 0x27e   :  { %5086 = vst [vmem:[#allocation30_spill] sm:$0xff] %v4677_v40  ;;  %v4681_v57 = vadd.f32 %v570_v56, %v337_v63 }
 0x27f   :  { %5087 = vst [vmem:[#allocation31_spill] sm:$0xff] %v4679_v54 }
 0x280   :  { %5088 = vst [vmem:[#allocation32_spill] sm:$0xff] %v4681_v57 }
 0x282   :  { %v574_v59 = vpop.f32.mrb[12].mxu0 }
 0x283   :  { %v4683_v61 = vadd.f32 %v574_v59, %v333_v62  ;;  %v576_v0 = vpop.f32.mrb[13].mxu0 }
 0x284   :  { %v4685_v1 = vadd.f32 %v576_v0, %v337_v63  ;;  %v578_v2 = vpop.f32.mrb[14].mxu0 }
 0x285   :  { %5089 = vst [vmem:[#allocation33_spill] sm:$0xff] %v4683_v61  ;;  %v4687_v3 = vadd.f32 %v578_v2, %v333_v62  ;;  %v580_v4 = vpop.f32.mrb[15].mxu0 }
 0x286   :  { %5090 = vst [vmem:[#allocation34_spill] sm:$0xff] %v4685_v1  ;;  %v4689_v8 = vadd.f32 %v580_v4, %v337_v63 }
 0x287   :  { %5091 = vst [vmem:[#allocation35_spill] sm:$0xff] %v4687_v3 }
 0x288   :  { %5092 = vst [vmem:[#allocation36_spill] sm:$0xff] %v4689_v8  ;;  %v3407_v8 = vmul.f32 -1.442695, %v970_v10 }
 0x28a   :  { %v617_v21 = vpop.f32.mrb[16].mxu0  ;;  %3913 = vpow2.f32 %v3407_v8 }
 0x28b   :  { %v619_v29 = vpop.f32.mrb[17].mxu0  ;;  %3915 = vpow2.f32 %v3406_v60 }
 0x28c   :  { %v621_v55 = vpop.f32.mrb[18].mxu0 }
 0x28d   :  { %v4691_v56 = vadd.f32 %v621_v55, %v341_v24  ;;  %v623_v59 = vpop.f32.mrb[19].mxu0 }
 0x28e   :  { %v4693_v38 = vadd.f32 %v623_v59, %v345_v33 }
 0x292   :  { %v627_v0 = vpop.f32.mrb[20].mxu0 }
 0x293   :  { %v4695_v1 = vadd.f32 %v627_v0, %v341_v24  ;;  %v629_v62 = vpop.f32.mrb[21].mxu0 }
 0x294   :  { %v4697_v2 = vadd.f32 %v629_v62, %v345_v33  ;;  %v631_v63 = vpop.f32.mrb[22].mxu0 }
 0x295   :  { %v4699_v4 = vadd.f32 %v631_v63, %v341_v24  ;;  %v633_v58 = vpop.f32.mrb[23].mxu0 }
 0x296   :  { %v4701_v13 = vadd.f32 %v633_v58, %v345_v33  ;;  %v3914_v58 = vpop.eup %3913 }
 0x297   :  { %v3916_v60 = vpop.eup %3915 }
 0x298   :  { %5093 = vst [vmem:[#allocation37_spill] sm:$0xff] %v4701_v13 }
 0x29a   :  { %v637_v16 = vpop.f32.mrb[24].mxu0 }
 0x29b   :  { %v4703_v55 = vadd.f32 %v637_v16, %v341_v24  ;;  %v639_v59 = vpop.f32.mrb[25].mxu0 }
 0x29c   :  { %v4705_v3 = vadd.f32 %v639_v59, %v345_v33  ;;  %v641_v0 = vpop.f32.mrb[26].mxu0 }
 0x29d   :  { %5094 = vst [vmem:[#allocation38_spill] sm:$0xff] %v4703_v55  ;;  %v4707_v61 = vadd.f32 %v641_v0, %v341_v24  ;;  %v643_v62 = vpop.f32.mrb[27].mxu0  ;;  %v976_v0 = vadd.f32 1.0, %v3916_v60  ;;  %v620_v55 = vadd.f32 %v619_v29, %v345_v33 }
 0x29e   :  { %5095 = vst [vmem:[#allocation39_spill] sm:$0xff] %v4705_v3  ;;  %v4709_v57 = vadd.f32 %v643_v62, %v345_v33  ;;  %v982_v3 = vadd.f32 1.0, %v3914_v58 }
 0x29f   :  { %5096 = vst [vmem:[#allocation40_spill] sm:$0xff] %v4707_v61  ;;  %v618_v61 = vadd.f32 %v617_v21, %v341_v24 }
 0x2a0   :  { %5097 = vst [vmem:[#allocation41_spill] sm:$0xff] %v4709_v57  ;;  %3917 = vrcp.f32 %v982_v3 }
 0x2a1   :  { %3919 = vrcp.f32 %v976_v0 }
 0x2a2   :  { %v647_v63 = vpop.f32.mrb[28].mxu0 }
 0x2a3   :  { %v4711_v54 = vadd.f32 %v647_v63, %v341_v24  ;;  %v649_v10 = vpop.f32.mrb[29].mxu0 }
 0x2a4   :  { %v4713_v7 = vadd.f32 %v649_v10, %v345_v33  ;;  %v651_v8 = vpop.f32.mrb[30].mxu0 }
 0x2a5   :  { %5098 = vst [vmem:[#allocation42_spill] sm:$0xff] %v4711_v54  ;;  %v4715_v16 = vadd.f32 %v651_v8, %v341_v24  ;;  %v653_v40 = vpop.f32.mrb[31].mxu0 }
 0x2a6   :  { %5099 = vst [vmem:[#allocation43_spill] sm:$0xff] %v4713_v7  ;;  %v4717_v59 = vadd.f32 %v653_v40, %v345_v33 }
 0x2a7   :  { %5100 = vst [vmem:[#allocation44_spill] sm:$0xff] %v4715_v16  ;;  %v689_v16 = vld [vmem:[#allocation9] sm:$0xff] }
 0x2a8   :  { %5101 = vst [vmem:[#allocation45_spill] sm:$0xff] %v4717_v59 }
 0x2aa   :  { %v962_v62 = vpop.f32.mrb[32].mxu0  ;;  %v3918_v8 = vpop.eup %3917 }
 0x2ab   :  { %v971_v57 = vadd.f32 %v962_v62, %v618_v61  ;;  %v964_v63 = vpop.f32.mrb[33].mxu0  ;;  %v3920_v13 = vpop.eup %3919  ;;  %v992_v59 = vmul.f32 %v3918_v8, %v689_v16  ;;  %v4832_v8 = vld [vmem:[#allocation15 + $0xe0] ss:$16 sps:$4 sm:$0xff]  }
 0x2ac   :  { %v972_v54 = vadd.f32 %v964_v63, %v620_v55  ;;  %v966_v30 = vpop.f32.mrb[34].mxu0 }
 0x2ad   :  { %3921 = vtanh.f32 %v971_v57  ;;  %v967_v10 = vpop.f32.mrb[35].mxu0  ;;  %v5102_v57 = vmov 0  }
 0x2ae   :  { %v3408_v7 = vmul.f32 -1.442695, %v972_v54 }
 0x2b0   :  { %3923 = vpow2.f32 %v3408_v7 }
 0x2b7   :  { %v3922_v40 = vpop.eup %3921 }
 0x2b8   :  { %v993_v58 = vmul.f32 %v3922_v40, %v3920_v13 }
 0x2ba   :  { %v3924_v60 = vpop.eup %3923  ;;  %v4719_v21 = vadd.f32 %v993_v58, %v992_v59 }
 0x2bb   :  { %v989_v24 = vadd.f32 1.0, %v3924_v60 }
 0x2bc   :  { %3925 = vtanh.f32 %v4719_v21 }
 0x2bd   :  { %3927 = vrcp.f32 %v989_v24 }
 0x2c6   :  { %v3926_v61 = vpop.eup %3925 }
 0x2c7   :  { %v3928_v3 = vpop.eup %3927 }
 0x2c8   :  { %v4722_v30 = vmul.f32 %v3928_v3, %v3926_v61 }
 0x2ca   :  { %v1002_v54 = vpack.c.bf16 %v4722_v30, %v4722_v30 }
 0x2cc   :  { %1228 = vmatmul.mubr.bf16.vlgmr.msra.gmra.mrb[12].mxu1 %v1002_v54  ;;  %1269 = vmatmul.mubr.bf16.vlgmr.msra.gmra.mrb[36].mxu0 %v1002_v54 }
 0x2cd   :  { %1504 = vmatpush1.bf16.msra.mxu1 %v4508_v6  ;;  %1545 = vmatpush1.bf16.msra.mxu0 %v4592_v37 }
 0x2ce   :  { %1505 = vmatprep.subr.bf16.mxu1 %v4514_v11  ;;  %1546 = vmatprep.subr.bf16.mxu0 %v4595_v39 }
 0x2cf   :  { %1535 = vmatprep.mubr.bf16.mxu1 %v5102_v57  ;;  %1576 = vmatprep.mubr.bf16.mxu0 %v5102_v57 }
 0x2d1   :  { %1506 = vmatpush1.bf16.msra.mxu1 %v4516_v12  ;;  %1547 = vmatpush1.bf16.msra.mxu0 %v4598_v41 }
 0x2d2   :  { %1507 = vmatprep.subr.bf16.mxu1 %v4519_v15  ;;  %1548 = vmatprep.subr.bf16.mxu0 %v4602_v42 }
 0x2d5   :  { %1508 = vmatpush1.bf16.msra.mxu1 %v4523_v17  ;;  %1549 = vmatpush1.bf16.msra.mxu0 %v4605_v43 }
 0x2d6   :  { %1509 = vmatprep.subr.bf16.mxu1 %v4526_v19  ;;  %1550 = vmatprep.subr.bf16.mxu0 %v4608_v44 }
 0x2d9   :  { %1510 = vmatpush1.bf16.msra.mxu1 %v4528_v20  ;;  %1551 = vmatpush1.bf16.msra.mxu0 %v4612_v45 }
 0x2da   :  { %1511 = vmatprep.subr.bf16.mxu1 %v4531_v23  ;;  %1552 = vmatprep.subr.bf16.mxu0 %v4616_v46 }
 0x2dd   :  { %1512 = vmatpush1.bf16.msra.mxu1 %v4534_v25  ;;  %1553 = vmatpush1.bf16.msra.mxu0 %v4619_v47 }
 0x2de   :  { %1513 = vmatprep.subr.bf16.mxu1 %v4539_v27  ;;  %1554 = vmatprep.subr.bf16.mxu0 %v4622_v48 }
 0x2e1   :  { %1514 = vmatpush1.bf16.msra.mxu1 %v4541_v28  ;;  %1555 = vmatpush1.bf16.msra.mxu0 %v4625_v49 }
 0x2e2   :  { %1515 = vmatprep.subr.bf16.mxu1 %v4545_v31  ;;  %1556 = vmatprep.subr.bf16.mxu0 %v4629_v50 }
 0x2e5   :  { %1516 = vmatpush1.bf16.msra.mxu1 %v4547_v32  ;;  %1557 = vmatpush1.bf16.msra.mxu0 %v4632_v51 }
 0x2e6   :  { %1517 = vmatprep.subr.bf16.mxu1 %v4551_v35  ;;  %1558 = vmatprep.subr.bf16.mxu0 %v4635_v52 }
 0x2e9   :  { %1518 = vmatpush1.bf16.msra.mxu1 %v4553_v36  ;;  %1559 = vmatpush1.bf16.msra.mxu0 %v4639_v53 }
 0x2ea   :  { %1852 = vmatprep.subr.bf16.mxu0 %v4590_v34 }
 0x39f   :  { %v1229_v6 = vpop.f32.mrb[12].mxu1  ;;  %v1270_v11 = vpop.f32.mrb[36].mxu0 }
 0x3a0   :  { %v1277_v12 = vadd.f32 %v1229_v6, %v4663_v5  ;;  %v1279_v15 = vadd.f32 %v1270_v11, %v4691_v56  ;;  %v1231_v17 = vpop.f32.mrb[13].mxu1  ;;  %v1272_v19 = vpop.f32.mrb[37].mxu0 }
 0x3a1   :  { %v1278_v20 = vadd.f32 %v1231_v17, %v4665_v9  ;;  %v1280_v23 = vadd.f32 %v1272_v19, %v4693_v38  ;;  %v1233_v25 = vpop.f32.mrb[14].mxu1  ;;  %v1274_v27 = vpop.f32.mrb[38].mxu0 }
 0x3a2   :  { %v3441_v28 = vmul.f32 -1.442695, %v1277_v12  ;;  %v1234_v31 = vpop.f32.mrb[15].mxu1  ;;  %v1275_v32 = vpop.f32.mrb[39].mxu0 }
 0x3a3   :  { %v3442_v35 = vmul.f32 -1.442695, %v1278_v20  ;;  %v3443_v36 = vmul.f32 -1.442695, %v1280_v23 }
 0x3a4   :  { %3929 = vpow2.f32 %v3441_v28 }
 0x3a5   :  { %3931 = vpow2.f32 %v3442_v35 }
 0x3a6   :  { %3933 = vpow2.f32 %v3443_v36 }
 0x3a7   :  { %3935 = vtanh.f32 %v1279_v15 }
 0x3ae   :  { %v3930_v34 = vpop.eup %3929 }
 0x3af   :  { %v3932_v29 = vpop.eup %3931  ;;  %v1284_v5 = vadd.f32 1.0, %v3930_v34 }
 0x3b0   :  { %v1290_v33 = vadd.f32 1.0, %v3932_v29  ;;  %v3934_v9 = vpop.eup %3933 }
 0x3b1   :  { %3937 = vrcp.f32 %v1284_v5  ;;  %v3936_v56 = vpop.eup %3935  ;;  %v1297_v7 = vadd.f32 1.0, %v3934_v9  ;;  %v4867_v9 = vld [vmem:[#allocation15 + $0xc] ss:$16 sps:$4 sm:$0xff]  }
 0x3b2   :  { %3939 = vrcp.f32 %v1290_v33 }
 0x3b3   :  { %3941 = vrcp.f32 %v1297_v7  ;;  %v4881_v7 = vld [vmem:[#allocation15 + $0x48] ss:$16 sps:$4 sm:$0xff]  }
 0x3bb   :  { %v3938_v38 = vpop.eup %3937 }
 0x3bc   :  { %v3940_v13 = vpop.eup %3939  ;;  %v1301_v55 = vmul.f32 %v3938_v38, %v3936_v56  ;;  %v4869_v56 = vld [vmem:[#allocation15 + $0x8] ss:$16 sps:$4 sm:$0xff]   ;;  %v4873_v38 = vld [vmem:[#allocation15 + $0x2c] ss:$16 sps:$4 sm:$0xff]  }
 0x3bd   :  { %v1300_v16 = vmul.f32 %v3940_v13, %v4719_v21  ;;  %v3942_v0 = vpop.eup %3941  ;;  %v4875_v13 = vld [vmem:[#allocation15 + $0x28] ss:$16 sps:$4 sm:$0xff]  }
 0x3bf   :  { %v4764_v59 = vadd.f32 %v1301_v55, %v1300_v16  ;;  %v4879_v55 = vld [vmem:[#allocation15 + $0x4c] ss:$16 sps:$4 sm:$0xff]  }
 0x3c0   :  { %v4885_v16 = vld [vmem:[#allocation15 + $0x6c] ss:$16 sps:$4 sm:$0xff]  }
 0x3c1   :  { %3943 = vtanh.f32 %v4764_v59 }
 0x3cb   :  { %v3944_v62 = vpop.eup %3943 }
 0x3cc   :  { %v4767_v63 = vmul.f32 %v3944_v62, %v3942_v0  ;;  %v4891_v0 = vld [vmem:[#allocation15 + $0x8c] ss:$16 sps:$4 sm:$0xff]   ;;  %v4893_v62 = vld [vmem:[#allocation15 + $0x88] ss:$16 sps:$4 sm:$0xff]  }
 0x3ce   :  { %v1310_v10 = vpack.c.bf16 %v4767_v63, %v4767_v63 }
 0x3d0   :  { %1536 = vmatmul.mubr.bf16.vlgmr.msra.gmra.mrb[16].mxu1 %v1310_v10  ;;  %1577 = vmatmul.mubr.bf16.vlgmr.msra.gmra.mrb[40].mxu0 %v1310_v10  ;;  %v4896_v10 = vld [vmem:[#allocation15 + $0xac] ss:$16 sps:$4 sm:$0xff]  }
 0x3d1   :  { %1853 = vmatpush1.bf16.msra.mxu0 %v4592_v37  ;;  %1843 = vmatprep.mubr.bf16.mxu1 %v5102_v57  ;;  %v4788_v37 = vld [vmem:[#allocation15 + $0x4] ss:$16 sps:$4 sm:$0xff]  }
 0x3d2   :  { %1854 = vmatprep.subr.bf16.mxu0 %v4595_v39  ;;  %1884 = vmatprep.mubr.bf16.mxu0 %v5102_v57  ;;  %v4790_v39 = vld [vmem:[#allocation15] ss:$16 sps:$4 sm:$0xff]  }
 0x3d3   :  { %1811 = vmatprep.subr.bf16.mxu1 %v4788_v37 }
 0x3d4   :  { %1812 = vmatpush1.bf16.msra.mxu1 %v4790_v39 }
 0x3d5   :  { %1855 = vmatpush1.bf16.msra.mxu0 %v4598_v41  ;;  %v4794_v41 = vld [vmem:[#allocation15 + $0x24] ss:$16 sps:$4 sm:$0xff]  }
 0x3d6   :  { %1856 = vmatprep.subr.bf16.mxu0 %v4602_v42  ;;  %v4796_v42 = vld [vmem:[#allocation15 + $0x20] ss:$16 sps:$4 sm:$0xff]   ;;  %1813 = vmatprep.subr.bf16.mxu1 %v4794_v41 }
 0x3d8   :  { %1814 = vmatpush1.bf16.msra.mxu1 %v4796_v42 }
 0x3d9   :  { %1857 = vmatpush1.bf16.msra.mxu0 %v4605_v43  ;;  %v4800_v43 = vld [vmem:[#allocation15 + $0x44] ss:$16 sps:$4 sm:$0xff]  }
 0x3da   :  { %1858 = vmatprep.subr.bf16.mxu0 %v4608_v44  ;;  %v4802_v44 = vld [vmem:[#allocation15 + $0x40] ss:$16 sps:$4 sm:$0xff]   ;;  %1815 = vmatprep.subr.bf16.mxu1 %v4800_v43 }
 0x3dc   :  { %1816 = vmatpush1.bf16.msra.mxu1 %v4802_v44 }
 0x3dd   :  { %1859 = vmatpush1.bf16.msra.mxu0 %v4612_v45  ;;  %v4806_v45 = vld [vmem:[#allocation15 + $0x64] ss:$16 sps:$4 sm:$0xff]  }
 0x3de   :  { %1860 = vmatprep.subr.bf16.mxu0 %v4616_v46  ;;  %v4808_v46 = vld [vmem:[#allocation15 + $0x60] ss:$16 sps:$4 sm:$0xff]   ;;  %1817 = vmatprep.subr.bf16.mxu1 %v4806_v45 }
 0x3e0   :  { %1818 = vmatpush1.bf16.msra.mxu1 %v4808_v46 }
 0x3e1   :  { %1861 = vmatpush1.bf16.msra.mxu0 %v4619_v47  ;;  %v4812_v47 = vld [vmem:[#allocation15 + $0x84] ss:$16 sps:$4 sm:$0xff]  }
 0x3e2   :  { %1862 = vmatprep.subr.bf16.mxu0 %v4622_v48  ;;  %v4814_v48 = vld [vmem:[#allocation15 + $0x80] ss:$16 sps:$4 sm:$0xff]   ;;  %1819 = vmatprep.subr.bf16.mxu1 %v4812_v47 }
 0x3e4   :  { %1820 = vmatpush1.bf16.msra.mxu1 %v4814_v48 }
 0x3e5   :  { %1863 = vmatpush1.bf16.msra.mxu0 %v4625_v49  ;;  %v4817_v49 = vld [vmem:[#allocation15 + $0xa4] ss:$16 sps:$4 sm:$0xff]  }
 0x3e6   :  { %1864 = vmatprep.subr.bf16.mxu0 %v4629_v50  ;;  %v4820_v50 = vld [vmem:[#allocation15 + $0xa0] ss:$16 sps:$4 sm:$0xff]   ;;  %1821 = vmatprep.subr.bf16.mxu1 %v4817_v49 }
 0x3e8   :  { %1822 = vmatpush1.bf16.msra.mxu1 %v4820_v50 }
 0x3e9   :  { %1865 = vmatpush1.bf16.msra.mxu0 %v4632_v51  ;;  %v4823_v51 = vld [vmem:[#allocation15 + $0xc4] ss:$16 sps:$4 sm:$0xff]  }
 0x3ea   :  { %1866 = vmatprep.subr.bf16.mxu0 %v4635_v52  ;;  %v4826_v52 = vld [vmem:[#allocation15 + $0xc0] ss:$16 sps:$4 sm:$0xff]   ;;  %1823 = vmatprep.subr.bf16.mxu1 %v4823_v51 }
 0x3ec   :  { %1824 = vmatpush1.bf16.msra.mxu1 %v4826_v52 }
 0x3ed   :  { %1867 = vmatpush1.bf16.msra.mxu0 %v4639_v53  ;;  %v4829_v53 = vld [vmem:[#allocation15 + $0xe4] ss:$16 sps:$4 sm:$0xff]  }
 0x3ee   :  { %1825 = vmatprep.subr.bf16.mxu1 %v4829_v53  ;;  %2160 = vmatprep.subr.bf16.mxu0 %v4867_v9 }
 0x3f0   :  { %1826 = vmatpush1.bf16.msra.mxu1 %v4832_v8 }
 0x3f1   :  { %2119 = vmatprep.subr.bf16.mxu1 %v4788_v37 }
 0x4a3   :  { %v1537_v40 = vpop.f32.mrb[16].mxu1  ;;  %v1578_v58 = vpop.f32.mrb[40].mxu0 }
 0x4a4   :  { %v1585_v60 = vadd.f32 %v1537_v40, %v4667_v14  ;;  %v1587_v21 = vadd.f32 %v1578_v58, %v4695_v1  ;;  %v1539_v24 = vpop.f32.mrb[17].mxu1  ;;  %v1580_v61 = vpop.f32.mrb[41].mxu0  ;;  %v4899_v40 = vld [vmem:[#allocation15 + $0xa8] ss:$16 sps:$4 sm:$0xff]   ;;  %v4902_v58 = vld [vmem:[#allocation15 + $0xcc] ss:$16 sps:$4 sm:$0xff]  }
 0x4a5   :  { %v1586_v3 = vadd.f32 %v1539_v24, %v4669_v18  ;;  %v1588_v54 = vadd.f32 %v1580_v61, %v4697_v2  ;;  %v1541_v6 = vpop.f32.mrb[18].mxu1  ;;  %v1582_v11 = vpop.f32.mrb[42].mxu0  ;;  %v4911_v24 = vld [vmem:[#allocation15 + $0xe8] ss:$16 sps:$4 sm:$0xff]  }
 0x4a6   :  { %v3476_v12 = vmul.f32 -1.442695, %v1585_v60  ;;  %v1542_v15 = vpop.f32.mrb[19].mxu1  ;;  %v1583_v17 = vpop.f32.mrb[43].mxu0  ;;  %v4905_v60 = vld [vmem:[#allocation15 + $0xc8] ss:$16 sps:$4 sm:$0xff]  }
 0x4a7   :  { %v3477_v19 = vmul.f32 -1.442695, %v1586_v3  ;;  %v3478_v20 = vmul.f32 -1.442695, %v1588_v54  ;;  %v5103_v17 = vld [vmem:[#allocation37_spill] sm:$0xff] }
 0x4a8   :  { %3945 = vpow2.f32 %v3476_v12 }
 0x4a9   :  { %3947 = vpow2.f32 %v3477_v19 }
 0x4aa   :  { %3949 = vpow2.f32 %v3478_v20 }
 0x4ab   :  { %3951 = vtanh.f32 %v1587_v21  ;;  %v4908_v21 = vld [vmem:[#allocation15 + $0xec] ss:$16 sps:$4 sm:$0xff]  }
 0x4b2   :  { %v3946_v23 = vpop.eup %3945 }
 0x4b3   :  { %v3948_v25 = vpop.eup %3947  ;;  %v1592_v14 = vadd.f32 1.0, %v3946_v23 }
 0x4b4   :  { %v1598_v1 = vadd.f32 1.0, %v3948_v25  ;;  %v3950_v18 = vpop.eup %3949 }
 0x4b5   :  { %3953 = vrcp.f32 %v1592_v14  ;;  %v3952_v27 = vpop.eup %3951  ;;  %v1605_v32 = vadd.f32 1.0, %v3950_v18 }
 0x4b6   :  { %3955 = vrcp.f32 %v1598_v1 }
 0x4b7   :  { %3957 = vrcp.f32 %v1605_v32 }
 0x4bf   :  { %v3954_v2 = vpop.eup %3953 }
 0x4c0   :  { %v3956_v28 = vpop.eup %3955  ;;  %v1609_v31 = vmul.f32 %v3954_v2, %v3952_v27 }
 0x4c1   :  { %v1608_v35 = vmul.f32 %v3956_v28, %v4764_v59  ;;  %v3958_v34 = vpop.eup %3957  ;;  %v4887_v59 = vld [vmem:[#allocation15 + $0x68] ss:$16 sps:$4 sm:$0xff]  }
 0x4c3   :  { %v4842_v36 = vadd.f32 %v1609_v31, %v1608_v35 }
 0x4c5   :  { %3959 = vtanh.f32 %v4842_v36 }
 0x4cf   :  { %v3960_v29 = vpop.eup %3959 }
 0x4d0   :  { %v4845_v5 = vmul.f32 %v3960_v29, %v3958_v34 }
 0x4d2   :  { %v1618_v33 = vpack.c.bf16 %v4845_v5, %v4845_v5 }
 0x4d4   :  { %1844 = vmatmul.mubr.bf16.vlgmr.msra.gmra.mrb[20].mxu1 %v1618_v33  ;;  %1885 = vmatmul.mubr.bf16.vlgmr.msra.gmra.mrb[44].mxu0 %v1618_v33 }
 0x4d5   :  { %2120 = vmatpush1.bf16.msra.mxu1 %v4790_v39  ;;  %2151 = vmatprep.mubr.bf16.mxu1 %v5102_v57 }
 0x4d6   :  { %2121 = vmatprep.subr.bf16.mxu1 %v4794_v41  ;;  %2192 = vmatprep.mubr.bf16.mxu0 %v5102_v57 }
 0x4d7   :  { %2161 = vmatpush1.bf16.msra.mxu0 %v4869_v56 }
 0x4d8   :  { %2162 = vmatprep.subr.bf16.mxu0 %v4873_v38 }
 0x4d9   :  { %2122 = vmatpush1.bf16.msra.mxu1 %v4796_v42 }
 0x4da   :  { %2123 = vmatprep.subr.bf16.mxu1 %v4800_v43 }
 0x4db   :  { %2163 = vmatpush1.bf16.msra.mxu0 %v4875_v13 }
 0x4dc   :  { %2164 = vmatprep.subr.bf16.mxu0 %v4879_v55 }
 0x4dd   :  { %2124 = vmatpush1.bf16.msra.mxu1 %v4802_v44 }
 0x4de   :  { %2125 = vmatprep.subr.bf16.mxu1 %v4806_v45 }
 0x4df   :  { %2165 = vmatpush1.bf16.msra.mxu0 %v4881_v7 }
 0x4e0   :  { %2166 = vmatprep.subr.bf16.mxu0 %v4885_v16 }
 0x4e1   :  { %2126 = vmatpush1.bf16.msra.mxu1 %v4808_v46 }
 0x4e2   :  { %2127 = vmatprep.subr.bf16.mxu1 %v4812_v47 }
 0x4e3   :  { %2167 = vmatpush1.bf16.msra.mxu0 %v4887_v59 }
 0x4e4   :  { %2168 = vmatprep.subr.bf16.mxu0 %v4891_v0 }
 0x4e5   :  { %2128 = vmatpush1.bf16.msra.mxu1 %v4814_v48 }
 0x4e6   :  { %2129 = vmatprep.subr.bf16.mxu1 %v4817_v49 }
 0x4e7   :  { %2169 = vmatpush1.bf16.msra.mxu0 %v4893_v62 }
 0x4e8   :  { %2170 = vmatprep.subr.bf16.mxu0 %v4896_v10 }
 0x4e9   :  { %2130 = vmatpush1.bf16.msra.mxu1 %v4820_v50 }
 0x4ea   :  { %2131 = vmatprep.subr.bf16.mxu1 %v4823_v51 }
 0x4eb   :  { %2171 = vmatpush1.bf16.msra.mxu0 %v4899_v40 }
 0x4ec   :  { %2172 = vmatprep.subr.bf16.mxu0 %v4902_v58 }
 0x4ed   :  { %2132 = vmatpush1.bf16.msra.mxu1 %v4826_v52 }
 0x4ee   :  { %2133 = vmatprep.subr.bf16.mxu1 %v4829_v53 }
 0x4ef   :  { %2173 = vmatpush1.bf16.msra.mxu0 %v4905_v60 }
 0x4f0   :  { %2174 = vmatprep.subr.bf16.mxu0 %v4908_v21 }
 0x4f1   :  { %2134 = vmatpush1.bf16.msra.mxu1 %v4832_v8 }
 0x4f2   :  { %2427 = vmatprep.subr.bf16.mxu1 %v4788_v37 }
 0x4f3   :  { %2175 = vmatpush1.bf16.msra.mxu0 %v4911_v24 }
 0x4f4   :  { %2468 = vmatprep.subr.bf16.mxu0 %v4867_v9 }
 0x5a7   :  { %v1845_v61 = vpop.f32.mrb[20].mxu1  ;;  %v1886_v3 = vpop.f32.mrb[44].mxu0 }
 0x5a8   :  { %v1893_v54 = vadd.f32 %v1845_v61, %v4671_v22  ;;  %v1895_v6 = vadd.f32 %v1886_v3, %v4699_v4  ;;  %v1847_v11 = vpop.f32.mrb[21].mxu1  ;;  %v1888_v12 = vpop.f32.mrb[45].mxu0 }
 0x5a9   :  { %v1894_v15 = vadd.f32 %v1847_v11, %v4673_v26  ;;  %v1896_v19 = vadd.f32 %v1888_v12, %v5103_v17  ;;  %v1849_v20 = vpop.f32.mrb[22].mxu1  ;;  %v1890_v23 = vpop.f32.mrb[46].mxu0 }
 0x5aa   :  { %v3511_v25 = vmul.f32 -1.442695, %v1893_v54  ;;  %v1850_v14 = vpop.f32.mrb[23].mxu1  ;;  %v1891_v1 = vpop.f32.mrb[47].mxu0 }
 0x5ab   :  { %v3512_v18 = vmul.f32 -1.442695, %v1894_v15  ;;  %v3513_v27 = vmul.f32 -1.442695, %v1896_v19  ;;  %v5104_v15 = vld [vmem:[#allocation29_spill] sm:$0xff]  ;;  %v5105_v19 = vld [vmem:[#allocation38_spill] sm:$0xff] }
 0x5ac   :  { %3961 = vpow2.f32 %v3511_v25  ;;  %v5106_v14 = vld [vmem:[#allocation30_spill] sm:$0xff] }
 0x5ad   :  { %3963 = vpow2.f32 %v3512_v18  ;;  %v5107_v18 = vld [vmem:[#allocation39_spill] sm:$0xff] }
 0x5ae   :  { %3965 = vpow2.f32 %v3513_v27 }
 0x5af   :  { %3967 = vtanh.f32 %v1895_v6 }
 0x5b6   :  { %v3962_v2 = vpop.eup %3961 }
 0x5b7   :  { %v3964_v28 = vpop.eup %3963  ;;  %v1900_v22 = vadd.f32 1.0, %v3962_v2 }
 0x5b8   :  { %v1906_v4 = vadd.f32 1.0, %v3964_v28  ;;  %v3966_v26 = vpop.eup %3965 }
 0x5b9   :  { %3969 = vrcp.f32 %v1900_v22  ;;  %v3968_v31 = vpop.eup %3967  ;;  %v1913_v29 = vadd.f32 1.0, %v3966_v26 }
 0x5ba   :  { %3971 = vrcp.f32 %v1906_v4 }
 0x5bb   :  { %3973 = vrcp.f32 %v1913_v29 }
 0x5c3   :  { %v3970_v32 = vpop.eup %3969 }
 0x5c4   :  { %v3972_v35 = vpop.eup %3971  ;;  %v1917_v34 = vmul.f32 %v3970_v32, %v3968_v31 }
 0x5c5   :  { %v1916_v33 = vmul.f32 %v3972_v35, %v4842_v36  ;;  %v3974_v3 = vpop.eup %3973 }
 0x5c7   :  { %v4921_v61 = vadd.f32 %v1917_v34, %v1916_v33 }
 0x5c9   :  { %3975 = vtanh.f32 %v4921_v61 }
 0x5d3   :  { %v3976_v54 = vpop.eup %3975 }
 0x5d4   :  { %v4924_v11 = vmul.f32 %v3976_v54, %v3974_v3 }
 0x5d6   :  { %v1926_v6 = vpack.c.bf16 %v4924_v11, %v4924_v11 }
 0x5d8   :  { %2152 = vmatmul.mubr.bf16.vlgmr.msra.gmra.mrb[24].mxu1 %v1926_v6  ;;  %2193 = vmatmul.mubr.bf16.vlgmr.msra.gmra.mrb[48].mxu0 %v1926_v6 }
 0x5d9   :  { %2428 = vmatpush1.bf16.msra.mxu1 %v4790_v39  ;;  %2469 = vmatpush1.bf16.msra.mxu0 %v4869_v56 }
 0x5da   :  { %2429 = vmatprep.subr.bf16.mxu1 %v4794_v41  ;;  %2470 = vmatprep.subr.bf16.mxu0 %v4873_v38 }
 0x5db   :  { %2459 = vmatprep.mubr.bf16.mxu1 %v5102_v57  ;;  %2500 = vmatprep.mubr.bf16.mxu0 %v5102_v57 }
 0x5dd   :  { %2430 = vmatpush1.bf16.msra.mxu1 %v4796_v42  ;;  %2471 = vmatpush1.bf16.msra.mxu0 %v4875_v13 }
 0x5de   :  { %2431 = vmatprep.subr.bf16.mxu1 %v4800_v43  ;;  %2472 = vmatprep.subr.bf16.mxu0 %v4879_v55 }
 0x5e1   :  { %2432 = vmatpush1.bf16.msra.mxu1 %v4802_v44  ;;  %2473 = vmatpush1.bf16.msra.mxu0 %v4881_v7 }
 0x5e2   :  { %2433 = vmatprep.subr.bf16.mxu1 %v4806_v45  ;;  %2474 = vmatprep.subr.bf16.mxu0 %v4885_v16 }
 0x5e5   :  { %2434 = vmatpush1.bf16.msra.mxu1 %v4808_v46  ;;  %2475 = vmatpush1.bf16.msra.mxu0 %v4887_v59 }
 0x5e6   :  { %2435 = vmatprep.subr.bf16.mxu1 %v4812_v47  ;;  %2476 = vmatprep.subr.bf16.mxu0 %v4891_v0 }
 0x5e9   :  { %2436 = vmatpush1.bf16.msra.mxu1 %v4814_v48  ;;  %2477 = vmatpush1.bf16.msra.mxu0 %v4893_v62 }
 0x5ea   :  { %2437 = vmatprep.subr.bf16.mxu1 %v4817_v49  ;;  %2478 = vmatprep.subr.bf16.mxu0 %v4896_v10 }
 0x5ed   :  { %2438 = vmatpush1.bf16.msra.mxu1 %v4820_v50  ;;  %2479 = vmatpush1.bf16.msra.mxu0 %v4899_v40 }
 0x5ee   :  { %2439 = vmatprep.subr.bf16.mxu1 %v4823_v51  ;;  %2480 = vmatprep.subr.bf16.mxu0 %v4902_v58 }
 0x5f1   :  { %2440 = vmatpush1.bf16.msra.mxu1 %v4826_v52  ;;  %2481 = vmatpush1.bf16.msra.mxu0 %v4905_v60 }
 0x5f2   :  { %2441 = vmatprep.subr.bf16.mxu1 %v4829_v53  ;;  %2482 = vmatprep.subr.bf16.mxu0 %v4908_v21 }
 0x5f5   :  { %2442 = vmatpush1.bf16.msra.mxu1 %v4832_v8  ;;  %2483 = vmatpush1.bf16.msra.mxu0 %v4911_v24 }
 0x5f6   :  { %2735 = vmatprep.subr.bf16.mxu1 %v4788_v37  ;;  %2776 = vmatprep.subr.bf16.mxu0 %v4867_v9 }
 0x6ab   :  { %v2153_v36 = vpop.f32.mrb[24].mxu1  ;;  %v2194_v12 = vpop.f32.mrb[48].mxu0 }
 0x6ac   :  { %v2201_v17 = vadd.f32 %v2153_v36, %v5104_v15  ;;  %v2203_v20 = vadd.f32 %v2194_v12, %v5105_v19  ;;  %v2155_v23 = vpop.f32.mrb[25].mxu1  ;;  %v2196_v25 = vpop.f32.mrb[49].mxu0 }
 0x6ad   :  { %v2202_v1 = vadd.f32 %v2155_v23, %v5106_v14  ;;  %v2204_v27 = vadd.f32 %v2196_v25, %v5107_v18  ;;  %v2157_v2 = vpop.f32.mrb[26].mxu1  ;;  %v2198_v28 = vpop.f32.mrb[50].mxu0 }
 0x6ae   :  { %v3546_v22 = vmul.f32 -1.442695, %v2201_v17  ;;  %v2158_v4 = vpop.f32.mrb[27].mxu1  ;;  %v2199_v26 = vpop.f32.mrb[51].mxu0 }
 0x6af   :  { %v3547_v37 = vmul.f32 -1.442695, %v2202_v1  ;;  %v3548_v31 = vmul.f32 -1.442695, %v2204_v27 }
 0x6b0   :  { %3977 = vpow2.f32 %v3546_v22 }
 0x6b1   :  { %3979 = vpow2.f32 %v3547_v37 }
 0x6b2   :  { %3981 = vpow2.f32 %v3548_v31 }
 0x6b3   :  { %3983 = vtanh.f32 %v2203_v20 }
 0x6ba   :  { %v3978_v32 = vpop.eup %3977 }
 0x6bb   :  { %v3980_v35 = vpop.eup %3979  ;;  %v2208_v34 = vadd.f32 1.0, %v3978_v32 }
 0x6bc   :  { %v2214_v29 = vadd.f32 1.0, %v3980_v35  ;;  %v3982_v33 = vpop.eup %3981 }
 0x6bd   :  { %3985 = vrcp.f32 %v2208_v34  ;;  %v3984_v3 = vpop.eup %3983  ;;  %v2221_v12 = vadd.f32 1.0, %v3982_v33 }
 0x6be   :  { %3987 = vrcp.f32 %v2214_v29 }
 0x6bf   :  { %3989 = vrcp.f32 %v2221_v12 }
 0x6c7   :  { %v3986_v54 = vpop.eup %3985 }
 0x6c8   :  { %v3988_v6 = vpop.eup %3987  ;;  %v2225_v36 = vmul.f32 %v3986_v54, %v3984_v3 }
 0x6c9   :  { %v2224_v15 = vmul.f32 %v3988_v6, %v4921_v61  ;;  %v3990_v19 = vpop.eup %3989  ;;  %v3905_v6 = vld [vmem:[#allocation18] sm:$0xff]  }
 0x6cb   :  { %v4967_v17 = vadd.f32 %v2225_v36, %v2224_v15  ;;  %v5112_v15 = vld [vmem:[#allocation33_spill] sm:$0xff] }
 0x6cd   :  { %3991 = vtanh.f32 %v4967_v17 }
 0x6d7   :  { %v3992_v23 = vpop.eup %3991 }
 0x6d8   :  { %v4970_v25 = vmul.f32 %v3992_v23, %v3990_v19  ;;  %v5113_v19 = vld [vmem:[#allocation42_spill] sm:$0xff] }
 0x6da   :  { %v2234_v20 = vpack.c.bf16 %v4970_v25, %v4970_v25 }
 0x6dc   :  { %2460 = vmatmul.mubr.bf16.vlgmr.msra.gmra.mrb[28].mxu1 %v2234_v20  ;;  %2501 = vmatmul.mubr.bf16.vlgmr.msra.gmra.mrb[52].mxu0 %v2234_v20 }
 0x6dd   :  { %2736 = vmatpush1.bf16.msra.mxu1 %v4790_v39  ;;  %2777 = vmatpush1.bf16.msra.mxu0 %v4869_v56 }
 0x6de   :  { %2737 = vmatprep.subr.bf16.mxu1 %v4794_v41  ;;  %2778 = vmatprep.subr.bf16.mxu0 %v4873_v38 }
 0x6df   :  { %2767 = vmatprep.mubr.bf16.mxu1 %v5102_v57  ;;  %2808 = vmatprep.mubr.bf16.mxu0 %v5102_v57 }
 0x6e1   :  { %2738 = vmatpush1.bf16.msra.mxu1 %v4796_v42  ;;  %2779 = vmatpush1.bf16.msra.mxu0 %v4875_v13  ;;  %v5108_v42 = vld [vmem:[#allocation31_spill] sm:$0xff] }
 0x6e2   :  { %2739 = vmatprep.subr.bf16.mxu1 %v4800_v43  ;;  %2780 = vmatprep.subr.bf16.mxu0 %v4879_v55 }
 0x6e5   :  { %2740 = vmatpush1.bf16.msra.mxu1 %v4802_v44  ;;  %2781 = vmatpush1.bf16.msra.mxu0 %v4881_v7  ;;  %v5109_v44 = vld [vmem:[#allocation40_spill] sm:$0xff] }
 0x6e6   :  { %2741 = vmatprep.subr.bf16.mxu1 %v4806_v45  ;;  %2782 = vmatprep.subr.bf16.mxu0 %v4885_v16 }
 0x6e9   :  { %2742 = vmatpush1.bf16.msra.mxu1 %v4808_v46  ;;  %2783 = vmatpush1.bf16.msra.mxu0 %v4887_v59 }
 0x6ea   :  { %2743 = vmatprep.subr.bf16.mxu1 %v4812_v47  ;;  %2784 = vmatprep.subr.bf16.mxu0 %v4891_v0 }
 0x6ed   :  { %2744 = vmatpush1.bf16.msra.mxu1 %v4814_v48  ;;  %2785 = vmatpush1.bf16.msra.mxu0 %v4893_v62  ;;  %v5110_v48 = vld [vmem:[#allocation32_spill] sm:$0xff] }
 0x6ee   :  { %2745 = vmatprep.subr.bf16.mxu1 %v4817_v49  ;;  %2786 = vmatprep.subr.bf16.mxu0 %v4896_v10 }
 0x6f1   :  { %2746 = vmatpush1.bf16.msra.mxu1 %v4820_v50  ;;  %2787 = vmatpush1.bf16.msra.mxu0 %v4899_v40  ;;  %v5111_v50 = vld [vmem:[#allocation41_spill] sm:$0xff] }
 0x6f2   :  { %2747 = vmatprep.subr.bf16.mxu1 %v4823_v51  ;;  %2788 = vmatprep.subr.bf16.mxu0 %v4902_v58 }
 0x6f5   :  { %2748 = vmatpush1.bf16.msra.mxu1 %v4826_v52  ;;  %2789 = vmatpush1.bf16.msra.mxu0 %v4905_v60 }
 0x6f6   :  { %2749 = vmatprep.subr.bf16.mxu1 %v4829_v53  ;;  %2790 = vmatprep.subr.bf16.mxu0 %v4908_v21 }
 0x6f9   :  { %2750 = vmatpush1.bf16.msra.mxu1 %v4832_v8  ;;  %2791 = vmatpush1.bf16.msra.mxu0 %v4911_v24 }
 0x6fa   :  { %3084 = vmatprep.subr.bf16.mxu0 %v4867_v9 }
 0x7af   :  { %v2461_v39 = vpop.f32.mrb[28].mxu1  ;;  %v2502_v41 = vpop.f32.mrb[52].mxu0 }
 0x7b0   :  { %v2509_v43 = vadd.f32 %v2461_v39, %v5108_v42  ;;  %v2511_v45 = vadd.f32 %v2502_v41, %v5109_v44  ;;  %v2463_v46 = vpop.f32.mrb[29].mxu1  ;;  %v2504_v47 = vpop.f32.mrb[53].mxu0  ;;  %v5114_v41 = vld [vmem:[#allocation34_spill] sm:$0xff] }
 0x7b1   :  { %v2510_v49 = vadd.f32 %v2463_v46, %v5110_v48  ;;  %v2512_v51 = vadd.f32 %v2504_v47, %v5111_v50  ;;  %v2465_v52 = vpop.f32.mrb[30].mxu1  ;;  %v2506_v53 = vpop.f32.mrb[54].mxu0 }
 0x7b2   :  { %v3581_v61 = vmul.f32 -1.442695, %v2509_v43  ;;  %v2466_v8 = vpop.f32.mrb[31].mxu1  ;;  %v2507_v14 = vpop.f32.mrb[55].mxu0  ;;  %v5115_v43 = vld [vmem:[#allocation43_spill] sm:$0xff] }
 0x7b3   :  { %v3582_v1 = vmul.f32 -1.442695, %v2510_v49  ;;  %v3583_v9 = vmul.f32 -1.442695, %v2512_v51 }
 0x7b4   :  { %3993 = vpow2.f32 %v3581_v61 }
 0x7b5   :  { %3995 = vpow2.f32 %v3582_v1 }
 0x7b6   :  { %3997 = vpow2.f32 %v3583_v9 }
 0x7b7   :  { %3999 = vtanh.f32 %v2511_v45 }
 0x7be   :  { %v3994_v18 = vpop.eup %3993 }
 0x7bf   :  { %v3996_v27 = vpop.eup %3995  ;;  %v2516_v2 = vadd.f32 1.0, %v3994_v18 }
 0x7c0   :  { %v2522_v28 = vadd.f32 1.0, %v3996_v27  ;;  %v3998_v22 = vpop.eup %3997 }
 0x7c1   :  { %4001 = vrcp.f32 %v2516_v2  ;;  %v4000_v4 = vpop.eup %3999  ;;  %v2529_v32 = vadd.f32 1.0, %v3998_v22 }
 0x7c2   :  { %4003 = vrcp.f32 %v2522_v28 }
 0x7c3   :  { %4005 = vrcp.f32 %v2529_v32  ;;  %v3906_v32 = vld [vmem:[#allocation18 + $0x8] sm:$0xff]  }
 0x7cb   :  { %v4002_v26 = vpop.eup %4001 }
 0x7cc   :  { %v4004_v37 = vpop.eup %4003  ;;  %v2533_v31 = vmul.f32 %v4002_v26, %v4000_v4 }
 0x7cd   :  { %v2532_v35 = vmul.f32 %v4004_v37, %v4967_v17  ;;  %v4006_v29 = vpop.eup %4005 }
 0x7cf   :  { %v5012_v34 = vadd.f32 %v2533_v31, %v2532_v35  ;;  %v3162_v35 = vpack.c.bf16 %v4767_v63, %v4722_v30  ;;  %v3912_v30 = vld [vmem:[#allocation18 + $0x38] sm:$0xff]   ;;  %v3163_v63 = vpack.c.bf16 %v4924_v11, %v4845_v5 }
 0x7d1   :  { %4007 = vtanh.f32 %v5012_v34 }
 0x7db   :  { %v4008_v33 = vpop.eup %4007 }
 0x7dc   :  { %v5015_v3 = vmul.f32 %v4008_v33, %v4006_v29  ;;  %v3908_v29 = vld [vmem:[#allocation18 + $0x18] sm:$0xff]   ;;  %v3909_v33 = vld [vmem:[#allocation18 + $0x20] sm:$0xff]  }
 0x7de   :  { %v2542_v54 = vpack.c.bf16 %v5015_v3, %v5015_v3 }
 0x7e0   :  { %2768 = vmatmul.mubr.bf16.vlgmr.msra.gmra.mrb[32].mxu1 %v2542_v54  ;;  %2809 = vmatmul.mubr.bf16.vlgmr.msra.gmra.mrb[56].mxu0 %v2542_v54  ;;  %v3910_v54 = vld [vmem:[#allocation18 + $0x28] sm:$0xff]  }
 0x7e1   :  { %3085 = vmatpush1.bf16.msra.mxu0 %v4869_v56  ;;  %3075 = vmatprep.mubr.bf16.mxu1 %v5102_v57  ;;  %v3881_v56 = vld [vmem:[#allocation15] ss:$16 sps:$4 sm:$0xff]  }
 0x7e2   :  { %3086 = vmatprep.subr.bf16.mxu0 %v4873_v38  ;;  %3116 = vmatprep.mubr.bf16.mxu0 %v5102_v57  ;;  %v3883_v57 = vld [vmem:[#allocation15 + $0x4] ss:$16 sps:$4 sm:$0xff]  }
 0x7e3   :  { %3043 = vmatprep.subr.bf16.mxu1 %v3883_v57  ;;  %v3886_v38 = vld [vmem:[#allocation15 + $0x24] ss:$16 sps:$4 sm:$0xff]  }
 0x7e4   :  { %3044 = vmatpush1.bf16.msra.mxu1 %v3881_v56  ;;  %v3911_v57 = vld [vmem:[#allocation18 + $0x30] sm:$0xff]   ;;  %v3164_v56 = vpack.c.bf16 %v5015_v3, %v4970_v25 }
 0x7e5   :  { %3087 = vmatpush1.bf16.msra.mxu0 %v4875_v13  ;;  %v3884_v13 = vld [vmem:[#allocation15 + $0x20] ss:$16 sps:$4 sm:$0xff]   ;;  %3045 = vmatprep.subr.bf16.mxu1 %v3886_v38 }
 0x7e6   :  { %3088 = vmatprep.subr.bf16.mxu0 %v4879_v55  ;;  %v3889_v55 = vld [vmem:[#allocation15 + $0x44] ss:$16 sps:$4 sm:$0xff]  }
 0x7e8   :  { %3046 = vmatpush1.bf16.msra.mxu1 %v3884_v13 }
 0x7e9   :  { %3089 = vmatpush1.bf16.msra.mxu0 %v4881_v7  ;;  %v3887_v7 = vld [vmem:[#allocation15 + $0x40] ss:$16 sps:$4 sm:$0xff]   ;;  %3047 = vmatprep.subr.bf16.mxu1 %v3889_v55  ;;  %v5116_v55 = vld [vmem:[#allocation35_spill] sm:$0xff] }
 0x7ea   :  { %3090 = vmatprep.subr.bf16.mxu0 %v4885_v16  ;;  %v3892_v16 = vld [vmem:[#allocation15 + $0x64] ss:$16 sps:$4 sm:$0xff]  }
 0x7ec   :  { %3048 = vmatpush1.bf16.msra.mxu1 %v3887_v7 }
 0x7ed   :  { %3091 = vmatpush1.bf16.msra.mxu0 %v4887_v59  ;;  %v3890_v59 = vld [vmem:[#allocation15 + $0x60] ss:$16 sps:$4 sm:$0xff]   ;;  %3049 = vmatprep.subr.bf16.mxu1 %v3892_v16 }
 0x7ee   :  { %3092 = vmatprep.subr.bf16.mxu0 %v4891_v0  ;;  %v3895_v0 = vld [vmem:[#allocation15 + $0x84] ss:$16 sps:$4 sm:$0xff]  }
 0x7ef   :  { %v5117_v16 = vld [vmem:[#allocation44_spill] sm:$0xff] }
 0x7f0   :  { %3050 = vmatpush1.bf16.msra.mxu1 %v3890_v59 }
 0x7f1   :  { %3093 = vmatpush1.bf16.msra.mxu0 %v4893_v62  ;;  %v3893_v62 = vld [vmem:[#allocation15 + $0x80] ss:$16 sps:$4 sm:$0xff]   ;;  %3051 = vmatprep.subr.bf16.mxu1 %v3895_v0 }
 0x7f2   :  { %3094 = vmatprep.subr.bf16.mxu0 %v4896_v10  ;;  %v3896_v10 = vld [vmem:[#allocation15 + $0xa0] ss:$16 sps:$4 sm:$0xff]  }
 0x7f4   :  { %3052 = vmatpush1.bf16.msra.mxu1 %v3893_v62 }
 0x7f5   :  { %3095 = vmatpush1.bf16.msra.mxu0 %v4899_v40  ;;  %v3898_v40 = vld [vmem:[#allocation15 + $0xa4] ss:$16 sps:$4 sm:$0xff]  }
 0x7f6   :  { %3096 = vmatprep.subr.bf16.mxu0 %v4902_v58  ;;  %v3901_v58 = vld [vmem:[#allocation15 + $0xc4] ss:$16 sps:$4 sm:$0xff]   ;;  %3053 = vmatprep.subr.bf16.mxu1 %v3898_v40 }
 0x7f8   :  { %3054 = vmatpush1.bf16.msra.mxu1 %v3896_v10  ;;  %v5118_v10 = vld [vmem:[#allocation36_spill] sm:$0xff] }
 0x7f9   :  { %3097 = vmatpush1.bf16.msra.mxu0 %v4905_v60  ;;  %v3899_v60 = vld [vmem:[#allocation15 + $0xc0] ss:$16 sps:$4 sm:$0xff]   ;;  %3055 = vmatprep.subr.bf16.mxu1 %v3901_v58  ;;  %v5119_v58 = vld [vmem:[#allocation45_spill] sm:$0xff] }
 0x7fa   :  { %3098 = vmatprep.subr.bf16.mxu0 %v4908_v21  ;;  %v3904_v21 = vld [vmem:[#allocation15 + $0xe4] ss:$16 sps:$4 sm:$0xff]  }
 0x7fc   :  { %3056 = vmatpush1.bf16.msra.mxu1 %v3899_v60 }
 0x7fd   :  { %3099 = vmatpush1.bf16.msra.mxu0 %v4911_v24  ;;  %v3902_v24 = vld [vmem:[#allocation15 + $0xe0] ss:$16 sps:$4 sm:$0xff]   ;;  %3057 = vmatprep.subr.bf16.mxu1 %v3904_v21 }
 0x800   :  { %3058 = vmatpush1.bf16.msra.mxu1 %v3902_v24 }
 0x801   :  { %3690 = vmatprep.subr.bf16.mxu1 %v3905_v6 }
 0x8b3   :  { %v2769_v36 = vpop.f32.mrb[32].mxu1  ;;  %v2810_v12 = vpop.f32.mrb[56].mxu0 }
 0x8b4   :  { %v2817_v17 = vadd.f32 %v2769_v36, %v5112_v15  ;;  %v2819_v23 = vadd.f32 %v2810_v12, %v5113_v19  ;;  %v2771_v20 = vpop.f32.mrb[33].mxu1  ;;  %v2812_v39 = vpop.f32.mrb[57].mxu0 }
 0x8b5   :  { %v2818_v42 = vadd.f32 %v2771_v20, %v5114_v41  ;;  %v2820_v44 = vadd.f32 %v2812_v39, %v5115_v43  ;;  %v2773_v45 = vpop.f32.mrb[34].mxu1  ;;  %v2814_v46 = vpop.f32.mrb[58].mxu0 }
 0x8b6   :  { %v3616_v47 = vmul.f32 -1.442695, %v2817_v17  ;;  %v2774_v48 = vpop.f32.mrb[35].mxu1  ;;  %v2815_v49 = vpop.f32.mrb[59].mxu0 }
 0x8b7   :  { %v3617_v50 = vmul.f32 -1.442695, %v2818_v42  ;;  %v3618_v51 = vmul.f32 -1.442695, %v2820_v44  ;;  %v3654_v44 = vld [vmem:[#allocation19] ss:$0 sm:$0xff] }
 0x8b8   :  { %4009 = vpow2.f32 %v3616_v47 }
 0x8b9   :  { %4011 = vpow2.f32 %v3617_v50 }
 0x8ba   :  { %4013 = vpow2.f32 %v3618_v51 }
 0x8bb   :  { %4015 = vtanh.f32 %v2819_v23 }
 0x8c2   :  { %v4010_v52 = vpop.eup %4009 }
 0x8c3   :  { %v4012_v53 = vpop.eup %4011  ;;  %v2824_v61 = vadd.f32 1.0, %v4010_v52 }
 0x8c4   :  { %v2830_v8 = vadd.f32 1.0, %v4012_v53  ;;  %v4014_v14 = vpop.eup %4013 }
 0x8c5   :  { %4017 = vrcp.f32 %v2824_v61  ;;  %v4016_v1 = vpop.eup %4015  ;;  %v2837_v2 = vadd.f32 1.0, %v4014_v14 }
 0x8c6   :  { %4019 = vrcp.f32 %v2830_v8 }
 0x8c7   :  { %4021 = vrcp.f32 %v2837_v2 }
 0x8cf   :  { %v4018_v9 = vpop.eup %4017 }
 0x8d0   :  { %v4020_v18 = vpop.eup %4019  ;;  %v2841_v27 = vmul.f32 %v4018_v9, %v4016_v1 }
 0x8d1   :  { %v2840_v28 = vmul.f32 %v4020_v18, %v5012_v34  ;;  %v4022_v4 = vpop.eup %4021  ;;  %v3907_v34 = vld [vmem:[#allocation18 + $0x10] sm:$0xff]  }
 0x8d3   :  { %v5041_v22 = vadd.f32 %v2841_v27, %v2840_v28 }
 0x8d5   :  { %4023 = vtanh.f32 %v5041_v22 }
 0x8df   :  { %v4024_v26 = vpop.eup %4023 }
 0x8e0   :  { %v5044_v37 = vmul.f32 %v4024_v26, %v4022_v4 }
 0x8e2   :  { %v2850_v31 = vpack.c.bf16 %v5044_v37, %v5044_v37 }
 0x8e4   :  { %3076 = vmatmul.mubr.bf16.vlgmr.msra.gmra.mrb[36].mxu1 %v2850_v31  ;;  %3117 = vmatmul.mubr.bf16.vlgmr.msra.gmra.mrb[60].mxu0 %v2850_v31 }
 0x8e5   :  { %3691 = vmatpush3.bf16.msra.mxu1 %v3905_v6  ;;  %3706 = vmatprep.mubr.bf16.mxu1 %v3162_v35 }
 0x8e6   :  { %3692 = vmatprep.subr.bf16.mxu1 %v3906_v32 }
 0x8e9   :  { %3693 = vmatpush3.bf16.msra.mxu1 %v3906_v32 }
 0x8ea   :  { %3694 = vmatprep.subr.bf16.mxu1 %v3907_v34 }
 0x8ed   :  { %3695 = vmatpush3.bf16.msra.mxu1 %v3907_v34 }
 0x8ee   :  { %3696 = vmatprep.subr.bf16.mxu1 %v3908_v29 }
 0x8f1   :  { %3697 = vmatpush3.bf16.msra.mxu1 %v3908_v29 }
 0x8f2   :  { %3698 = vmatprep.subr.bf16.mxu1 %v3909_v33 }
 0x8f5   :  { %3699 = vmatpush3.bf16.msra.mxu1 %v3909_v33 }
 0x8f6   :  { %3700 = vmatprep.subr.bf16.mxu1 %v3910_v54 }
 0x8f9   :  { %3701 = vmatpush3.bf16.msra.mxu1 %v3910_v54 }
 0x8fa   :  { %3702 = vmatprep.subr.bf16.mxu1 %v3911_v57 }
 0x8fd   :  { %3703 = vmatpush3.bf16.msra.mxu1 %v3911_v57 }
 0x8fe   :  { %3704 = vmatprep.subr.bf16.mxu1 %v3912_v30 }
 0x901   :  { %3705 = vmatpush3.bf16.msra.mxu1 %v3912_v30 }
 0x904   :  { %3707 = vmatmul.mubr.bf16.vlgmr.msra.gmra.mrb[40].mxu1 %v3163_v63 }
 0x905   :  { %3710 = vmatprep.mubr.bf16.mxu1 %v3164_v56 }
 0x9b7   :  { %v3077_v38 = vpop.f32.mrb[36].mxu1  ;;  %v3118_v13 = vpop.f32.mrb[60].mxu0 }
 0x9b8   :  { %v3125_v7 = vadd.f32 %v3077_v38, %v5116_v55  ;;  %v3127_v59 = vadd.f32 %v3118_v13, %v5117_v16  ;;  %v3079_v0 = vpop.f32.mrb[37].mxu1  ;;  %v3120_v62 = vpop.f32.mrb[61].mxu0 }
 0x9b9   :  { %v3126_v40 = vadd.f32 %v3079_v0, %v5118_v10  ;;  %v3128_v60 = vadd.f32 %v3120_v62, %v5119_v58  ;;  %v3081_v21 = vpop.f32.mrb[38].mxu1  ;;  %v3122_v24 = vpop.f32.mrb[62].mxu0 }
 0x9ba   :  { %v3651_v5 = vmul.f32 -1.442695, %v3125_v7  ;;  %v3082_v11 = vpop.f32.mrb[39].mxu1  ;;  %v3123_v6 = vpop.f32.mrb[63].mxu0 }
 0x9bb   :  { %v3652_v25 = vmul.f32 -1.442695, %v3126_v40  ;;  %v3653_v3 = vmul.f32 -1.442695, %v3128_v60 }
 0x9bc   :  { %4025 = vpow2.f32 %v3651_v5 }
 0x9bd   :  { %4027 = vpow2.f32 %v3652_v25 }
 0x9be   :  { %4029 = vpow2.f32 %v3653_v3 }
 0x9bf   :  { %4031 = vtanh.f32 %v3127_v59 }
 0x9c6   :  { %v4026_v36 = vpop.eup %4025 }
 0x9c7   :  { %v4028_v12 = vpop.eup %4027  ;;  %v3132_v15 = vadd.f32 1.0, %v4026_v36 }
 0x9c8   :  { %v3138_v17 = vadd.f32 1.0, %v4028_v12  ;;  %v4030_v19 = vpop.eup %4029 }
 0x9c9   :  { %4033 = vrcp.f32 %v3132_v15  ;;  %v4032_v23 = vpop.eup %4031  ;;  %v3145_v42 = vadd.f32 1.0, %v4030_v19 }
 0x9ca   :  { %4035 = vrcp.f32 %v3138_v17 }
 0x9cb   :  { %4037 = vrcp.f32 %v3145_v42 }
 0x9d3   :  { %v4034_v20 = vpop.eup %4033 }
 0x9d4   :  { %v4036_v39 = vpop.eup %4035  ;;  %v3149_v41 = vmul.f32 %v4034_v20, %v4032_v23 }
 0x9d5   :  { %v3148_v43 = vmul.f32 %v4036_v39, %v5041_v22  ;;  %v4038_v61 = vpop.eup %4037 }
 0x9d7   :  { %v3708_v45 = vpop.f32.mrb[40].mxu1  ;;  %v3150_v46 = vadd.f32 %v3149_v41, %v3148_v43 }
 0x9d8   :  { %v3280_v47 = vadd.f32 %v3708_v45, %v3654_v44  ;;  %v3271_v48 = vpop.f32.mrb[41].mxu1 }
 0x9d9   :  { %v3272_v49 = vadd.f32 %v3654_v44, %v3271_v48  ;;  %v3709_v50 = vpop.f32.mrb[42].mxu1  ;;  %4039 = vtanh.f32 %v3150_v46 }
 0x9da   :  { %3304 = vst [vmem:[#allocation21 + $0x10] sm:$0xff] %v3280_v47  ;;  %v3283_v51 = vadd.f32 %v3709_v50, %v3654_v44  ;;  %v3274_v52 = vpop.f32.mrb[43].mxu1 }
 0x9db   :  { %3302 = vst [vmem:[#allocation21] sm:$0xff] %v3272_v49  ;;  %v3275_v53 = vadd.f32 %v3654_v44, %v3274_v52 }
 0x9dc   :  { %3305 = vst [vmem:[#allocation21 + $0x18] sm:$0xff] %v3283_v51 }
 0x9dd   :  { %3303 = vst [vmem:[#allocation21 + $0x8] sm:$0xff] %v3275_v53 }
 0x9e3   :  { %v4040_v8 = vpop.eup %4039 }
 0x9e4   :  { %v3152_v14 = vmul.f32 %v4040_v8, %v4038_v61 }
 0x9e6   :  { %v3165_v1 = vpack.c.bf16 %v3152_v14, %v5044_v37 }
 0x9e8   :  { %3711 = vmatmul.mubr.bf16.gmra.mrb[44].mxu1 %v3165_v1 }
 0xabb   :  { %v3712_v9 = vpop.f32.mrb[44].mxu1 }
 0xabc   :  { %v3296_v18 = vadd.f32 %v3712_v9, %v3654_v44  ;;  %v3287_v27 = vpop.f32.mrb[45].mxu1 }
 0xabd   :  { %v3288_v2 = vadd.f32 %v3654_v44, %v3287_v27  ;;  %v3713_v28 = vpop.f32.mrb[46].mxu1 }
 0xabe   :  { %3308 = vst [vmem:[#allocation21 + $0x30] sm:$0xff] %v3296_v18  ;;  %v3299_v22 = vadd.f32 %v3713_v28, %v3654_v44  ;;  %v3290_v4 = vpop.f32.mrb[47].mxu1 }
 0xabf   :  { %3306 = vst [vmem:[#allocation21 + $0x20] sm:$0xff] %v3288_v2  ;;  %v3291_v26 = vadd.f32 %v3654_v44, %v3290_v4 }
 0xac0   :  { %3309 = vst [vmem:[#allocation21 + $0x38] sm:$0xff] %v3299_v22 }
 0xac1   :  { %3307 = vst [vmem:[#allocation21 + $0x28] sm:$0xff] %v3291_v26 }
 0xac2   :  { %4272 = shalt.err (!%p4269_p0)
}
 0xac3   :  { %s4273_s21 = scalar_lea.hbm %s5082_s10, 1024 }
 0xac4   :  { %p4274_p1 = scmp.ne.s32.totalorder %s5082_s10, %s4273_s21  ;;  %p4277_p2 = scmp.lt.u32.totalorder %s4273_s21, %s5082_s10 }
 0xac6   :  { %p4279_p3 = pnand %p4277_p2, %p4274_p1 }
 0xac8   :  { %4282 = shalt.err (!%p4279_p3)
}
 0xac9   :  { %s4313_s7 = smov 128   ;;  %s4314_s13 = smov 8  }
 0xaca   :  { %3321 = dma.vmem_to_hbm [thread:$0]  %s3316_s28, 1024, %s5082_s10, [#allocation6], %s4313_s7, %s4313_s7, %s4314_s13  }
 0xacb   :  { %4295 = dma.done.wait [#allocation6], 1024  }
 0xacc   :  { %4296 = vsyncadd [#allocation6], 4294966272 }
 0xacd   :  { %3325 = vsyncpa [#allocation5], 1 }
 0xace   :  { %3326 = vsyncpa [#allocation8], 1 }
 0xacf   :  { %3327 = vsyncpa [#allocation11], 1 }
 0xad0   :  { %3328 = vsyncpa [#allocation14], 1 }
 0xad1   :  { %3329 = vsyncpa [#allocation17], 1 }
 0xad2   :  { %3330 = vsyncpa [#allocation20], 1 }
 0xad3   :  { %3331 = vsyncpa [#allocation6], 1 }

</bundles_post_ra>
